<compile_context>
chip_gen: v7x
topology: tpu7x:2x2x1
jax: 0.10.0
libtpu: 0.0.40
codegen_flags: <defaults>
</compile_context>

<pallas_src>
import functools
import math

import jax
import jax.numpy as jnp
import numpy as np
from jax import lax
from jax.experimental import pallas as pl
from jax.experimental.pallas import tpu as pltpu

D_MODEL = 128
NHEAD = 4
HEAD_DIM = D_MODEL // NHEAD
LN_EPS = 1e-5


def _cross_attention_kernel(q_ref, k_ref, v_ref,
                            wq_ref, wk_ref, wv_ref, wo_ref,
                            vecs_ref, out_ref, *, Bt, Lq, Lk):
    D = D_MODEL
    M = Bt * Lq

    # Packed (8, D) vector tile: rows 0..5 = bq, bk, bv, bo, gamma, beta.
    bq = vecs_ref[0:1, :]
    bk = vecs_ref[1:2, :]
    bv = vecs_ref[2:3, :]
    bo = vecs_ref[3:4, :]
    gamma = vecs_ref[4:5, :]
    beta = vecs_ref[5:6, :]

    # Q is streamed f32 (needed at full precision for the residual); its
    # projection operand is cast to bf16.  K/V arrive already in bf16.
    x_q = q_ref[...]                                  # (M, D) f32
    xq_b = x_q.astype(jnp.bfloat16)
    xk_b = k_ref[...]                                 # (Mk, D) bf16
    xv_b = v_ref[...]                                 # (Mk, D) bf16

    # Weights already bf16 (pre-cast in the wrapper).
    wq_b = wq_ref[...]
    wk_b = wk_ref[...]
    wv_b = wv_ref[...]
    wo_b = wo_ref[...]

    # Input projections on the big flat slabs; f32 accumulation, bias once.
    q = jnp.dot(xq_b, wq_b, preferred_element_type=jnp.float32) + bq
    k = jnp.dot(xk_b, wk_b, preferred_element_type=jnp.float32) + bk
    v = jnp.dot(xv_b, wv_b, preferred_element_type=jnp.float32) + bv

    # Back to (Bt, L, D) for batched per-head attention.
    q3 = q.reshape(Bt, Lq, D).astype(jnp.bfloat16)
    k3 = k.reshape(Bt, Lk, D).astype(jnp.bfloat16)
    v3 = v.reshape(Bt, Lk, D).astype(jnp.bfloat16)

    scale = 1.0 / math.sqrt(HEAD_DIM)

    # Per-head attention (static unrolled loop).  Head outputs are
    # lane-concatenated once so the output projection runs as a single
    # full-depth (K=128) MXU matmul instead of four K=32 matmuls.
    head_outs = []
    for h in range(NHEAD):
        lo = h * HEAD_DIM
        hi = lo + HEAD_DIM
        qh = q3[:, :, lo:hi]                          # (Bt, Lq, hd)
        kh = k3[:, :, lo:hi]                          # (Bt, Lk, hd)
        vh = v3[:, :, lo:hi]                          # (Bt, Lk, hd)

        # Scores: contract on head dim, batch on Bt -> no explicit transpose.
        s = lax.dot_general(
            qh, kh,
            dimension_numbers=(((2,), (2,)), ((0,), (0,))),
            preferred_element_type=jnp.float32) * scale      # (Bt, Lq, Lk)

        # Softmax in f32.
        s = s - jnp.max(s, axis=-1, keepdims=True)
        p = jnp.exp(s)
        p = p * pl.reciprocal(jnp.sum(p, axis=-1, keepdims=True), approx=True)

        o_h = lax.dot_general(
            p.astype(jnp.bfloat16), vh,
            dimension_numbers=(((2,), (1,)), ((0,), (0,))),
            preferred_element_type=jnp.float32)              # (Bt, Lq, hd)
        head_outs.append(o_h)

    o = jnp.concatenate(head_outs, axis=-1).reshape(M, D)     # (M, D) f32
    attn_out = jnp.dot(o.astype(jnp.bfloat16), wo_b,
                       preferred_element_type=jnp.float32) + bo

    # Residual (dropout = identity in eval) + LayerNorm over last dim (f32).
    res = x_q + attn_out
    mean = jnp.mean(res, axis=-1, keepdims=True)
    cen = res - mean
    var = jnp.mean(cen * cen, axis=-1, keepdims=True)
    y = cen * lax.rsqrt(var + LN_EPS) * gamma + beta

    out_ref[...] = y.astype(out_ref.dtype)


def cross_attention(Q, K, V, params, *, block_b=64):
    B, Lq, D = Q.shape
    _, Lk, _ = K.shape
    assert D == D_MODEL

    # Pick the batch tile: big enough for MXU/HBM efficiency, and such that the
    # flat bf16 K/V blocks have a sublane extent that is a multiple of 16
    # (f32 Q/out need a multiple of 8).
    Bt = min(block_b, B)
    while (Bt * Lq) % 16 or (Bt * Lk) % 16:
        Bt += 1
    pad = (-B) % Bt
    if pad:
        Q = jnp.concatenate([Q, jnp.zeros((pad, Lq, D), Q.dtype)], axis=0)
        K = jnp.concatenate([K, jnp.zeros((pad, Lk, D), K.dtype)], axis=0)
        V = jnp.concatenate([V, jnp.zeros((pad, Lk, D), V.dtype)], axis=0)
    Bp = B + pad
    grid = (Bp // Bt,)

    # Flatten to lane-dense 2-D slabs (Bt*L rows per step).
    Qf = Q.astype(jnp.float32).reshape(Bp * Lq, D)            # f32 (residual)
    Kf = K.astype(jnp.bfloat16).reshape(Bp * Lk, D)           # bf16 stream
    Vf = V.astype(jnp.bfloat16).reshape(Bp * Lk, D)           # bf16 stream

    # Pre-cast weights to bf16 once (MXU operands); biases/LN stay f32.
    wq_b = params["wq"].astype(jnp.bfloat16)
    wk_b = params["wk"].astype(jnp.bfloat16)
    wv_b = params["wv"].astype(jnp.bfloat16)
    wo_b = params["wo"].astype(jnp.bfloat16)

    # Pack six (1, D) vectors into one (8, D) tile: 1 DMA / buffer instead of 6.
    vecs = jnp.concatenate(
        [params["bq"], params["bk"], params["bv"],
         params["bo"], params["gamma"], params["beta"],
         jnp.zeros((2, D), jnp.float32)], axis=0)             # (8, D)

    kernel = functools.partial(_cross_attention_kernel, Bt=Bt, Lq=Lq, Lk=Lk)

    out = pl.pallas_call(
        kernel,
        out_shape=jax.ShapeDtypeStruct((Bp * Lq, D), jnp.float32),
        grid_spec=pltpu.PrefetchScalarGridSpec(
            num_scalar_prefetch=0,
            grid=grid,
            in_specs=[
                pl.BlockSpec((Bt * Lq, D), lambda b: (b, 0)),  # Q (f32)
                pl.BlockSpec((Bt * Lk, D), lambda b: (b, 0)),  # K (bf16)
                pl.BlockSpec((Bt * Lk, D), lambda b: (b, 0)),  # V (bf16)
                pl.BlockSpec((D, D), lambda b: (0, 0)),        # Wq (bf16)
                pl.BlockSpec((D, D), lambda b: (0, 0)),        # Wk (bf16)
                pl.BlockSpec((D, D), lambda b: (0, 0)),        # Wv (bf16)
                pl.BlockSpec((D, D), lambda b: (0, 0)),        # Wo (bf16)
                pl.BlockSpec((8, D), lambda b: (0, 0)),        # packed vectors
            ],
            out_specs=pl.BlockSpec((Bt * Lq, D), lambda b: (b, 0)),
        ),
        compiler_params=pltpu.CompilerParams(
            dimension_semantics=("parallel",)),
    )(Qf, Kf, Vf, wq_b, wk_b, wv_b, wo_b, vecs)

    out = out.reshape(Bp, Lq, D)
    return out[:B] if pad else out


def reference(Q, K, V, params):
    # Pure-JAX f32 reference of the same math for a correctness check.
    q = Q @ params["wq"] + params["bq"]
    k = K @ params["wk"] + params["bk"]
    v = V @ params["wv"] + params["bv"]
    B, Lq, D = Q.shape
    Lk = K.shape[1]
    qh = q.reshape(B, Lq, NHEAD, HEAD_DIM).transpose(0, 2, 1, 3)
    kh = k.reshape(B, Lk, NHEAD, HEAD_DIM).transpose(0, 2, 1, 3)
    vh = v.reshape(B, Lk, NHEAD, HEAD_DIM).transpose(0, 2, 1, 3)
    s = jnp.einsum("bhqd,bhkd->bhqk", qh, kh) / math.sqrt(HEAD_DIM)
    p = jax.nn.softmax(s, axis=-1)
    o = jnp.einsum("bhqk,bhkd->bhqd", p, vh).transpose(0, 2, 1, 3).reshape(B, Lq, D)
    attn_out = o @ params["wo"] + params["bo"]
    res = Q + attn_out
    mean = res.mean(-1, keepdims=True)
    var = ((res - mean) ** 2).mean(-1, keepdims=True)
    return (res - mean) / jnp.sqrt(var + LN_EPS) * params["gamma"] + params["beta"]


def init_params(key):
    # Deterministic synthetic init matching nn.MultiheadAttention / LayerNorm shapes.
    ks = jax.random.split(key, 8)
    scale = 1.0 / math.sqrt(D_MODEL)
    # in_proj_weight is (3D, D) in PyTorch; projection is x @ W^T.  We store W^T.
    wq = jax.random.normal(ks[0], (D_MODEL, D_MODEL), jnp.float32) * scale
    wk = jax.random.normal(ks[1], (D_MODEL, D_MODEL), jnp.float32) * scale
    wv = jax.random.normal(ks[2], (D_MODEL, D_MODEL), jnp.float32) * scale
    wo = jax.random.normal(ks[3], (D_MODEL, D_MODEL), jnp.float32) * scale
    bq = jax.random.normal(ks[4], (1, D_MODEL), jnp.float32) * 0.02
    bk = jax.random.normal(ks[5], (1, D_MODEL), jnp.float32) * 0.02
    bv = jax.random.normal(ks[6], (1, D_MODEL), jnp.float32) * 0.02
    bo = jax.random.normal(ks[7], (1, D_MODEL), jnp.float32) * 0.02
    gamma = jnp.ones((1, D_MODEL), jnp.float32)
    beta = jnp.zeros((1, D_MODEL), jnp.float32)
    return dict(wq=wq, wk=wk, wv=wv, wo=wo, bq=bq, bk=bk, bv=bv, bo=bo,
                gamma=gamma, beta=beta)


if __name__ == "__main__":
    key = jax.random.PRNGKey(0)
    kq, kk, kv, kp = jax.random.split(key, 4)
    B, Lq, Lk = 2, 8, 8
    Q = jax.random.normal(kq, (B, Lq, D_MODEL), jnp.float32)
    K = jax.random.normal(kk, (B, Lk, D_MODEL), jnp.float32)
    V = jax.random.normal(kv, (B, Lk, D_MODEL), jnp.float32)
    params = init_params(kp)

    out = cross_attention(Q, K, V, params)
    out = jax.block_until_ready(out)

    ref = jax.block_until_ready(reference(Q, K, V, params))
    # bf16 MXU operands -> looser tolerance than the pure-f32 version.
    np.testing.assert_allclose(np.asarray(out), np.asarray(ref), rtol=2e-2, atol=2e-2)

    print("KERNEL_OK")
</pallas_src>

<mosaic_0001>
module attributes {stable_mosaic.version = 11 : i64} {
  func.func @_cross_attention_kernel(%arg0: i32, %arg1: memref<16x128xf32, #tpu.memory_space<vmem>>, %arg2: memref<16x128xbf16, #tpu.memory_space<vmem>>, %arg3: memref<16x128xbf16, #tpu.memory_space<vmem>>, %arg4: memref<128x128xbf16, #tpu.memory_space<vmem>>, %arg5: memref<128x128xbf16, #tpu.memory_space<vmem>>, %arg6: memref<128x128xbf16, #tpu.memory_space<vmem>>, %arg7: memref<128x128xbf16, #tpu.memory_space<vmem>>, %arg8: memref<8x128xf32, #tpu.memory_space<vmem>>, %arg9: memref<16x128xf32, #tpu.memory_space<vmem>>) attributes {dimension_semantics = [#tpu.dimension_semantics<parallel>], iteration_bounds = array<i64: 1>, scalar_prefetch = 0 : i64, scratch_operands = 0 : i64, tpu.core_type = #tpu.core_type<tc>, window_params = [{transform_indices = @transform_0, window_bounds = array<i64: 16, 128>}, {transform_indices = @transform_1, window_bounds = array<i64: 16, 128>}, {transform_indices = @transform_2, window_bounds = array<i64: 16, 128>}, {pipeline_mode = #tpu.pipeline_mode<synchronous>, transform_indices = @transform_3, window_bounds = array<i64: 128, 128>}, {pipeline_mode = #tpu.pipeline_mode<synchronous>, transform_indices = @transform_4, window_bounds = array<i64: 128, 128>}, {pipeline_mode = #tpu.pipeline_mode<synchronous>, transform_indices = @transform_5, window_bounds = array<i64: 128, 128>}, {pipeline_mode = #tpu.pipeline_mode<synchronous>, transform_indices = @transform_6, window_bounds = array<i64: 128, 128>}, {pipeline_mode = #tpu.pipeline_mode<synchronous>, transform_indices = @transform_7, window_bounds = array<i64: 8, 128>}, {transform_indices = @transform_8, window_bounds = array<i64: 16, 128>}]} {
    %c0 = arith.constant 0 : index
    %c0_0 = arith.constant 0 : index
    %0 = vector.load %arg8[%c0, %c0_0] : memref<8x128xf32, #tpu.memory_space<vmem>>, vector<1x128xf32>
    %c1 = arith.constant 1 : index
    %c0_1 = arith.constant 0 : index
    %1 = vector.load %arg8[%c1, %c0_1] : memref<8x128xf32, #tpu.memory_space<vmem>>, vector<1x128xf32>
    %c2 = arith.constant 2 : index
    %c0_2 = arith.constant 0 : index
    %2 = vector.load %arg8[%c2, %c0_2] : memref<8x128xf32, #tpu.memory_space<vmem>>, vector<1x128xf32>
    %c3 = arith.constant 3 : index
    %c0_3 = arith.constant 0 : index
    %3 = vector.load %arg8[%c3, %c0_3] : memref<8x128xf32, #tpu.memory_space<vmem>>, vector<1x128xf32>
    %c4 = arith.constant 4 : index
    %c0_4 = arith.constant 0 : index
    %4 = vector.load %arg8[%c4, %c0_4] : memref<8x128xf32, #tpu.memory_space<vmem>>, vector<1x128xf32>
    %c5 = arith.constant 5 : index
    %c0_5 = arith.constant 0 : index
    %5 = vector.load %arg8[%c5, %c0_5] : memref<8x128xf32, #tpu.memory_space<vmem>>, vector<1x128xf32>
    %c0_6 = arith.constant 0 : index
    %c0_7 = arith.constant 0 : index
    %6 = vector.load %arg1[%c0_6, %c0_7] : memref<16x128xf32, #tpu.memory_space<vmem>>, vector<16x128xf32>
    %7 = arith.truncf %6 : vector<16x128xf32> to vector<16x128xbf16>
    %c0_8 = arith.constant 0 : index
    %c0_9 = arith.constant 0 : index
    %8 = vector.load %arg2[%c0_8, %c0_9] : memref<16x128xbf16, #tpu.memory_space<vmem>>, vector<16x128xbf16>
    %c0_10 = arith.constant 0 : index
    %c0_11 = arith.constant 0 : index
    %9 = vector.load %arg3[%c0_10, %c0_11] : memref<16x128xbf16, #tpu.memory_space<vmem>>, vector<16x128xbf16>
    %c0_12 = arith.constant 0 : index
    %c0_13 = arith.constant 0 : index
    %10 = vector.load %arg4[%c0_12, %c0_13] : memref<128x128xbf16, #tpu.memory_space<vmem>>, vector<128x128xbf16>
    %c0_14 = arith.constant 0 : index
    %c0_15 = arith.constant 0 : index
    %11 = vector.load %arg5[%c0_14, %c0_15] : memref<128x128xbf16, #tpu.memory_space<vmem>>, vector<128x128xbf16>
    %c0_16 = arith.constant 0 : index
    %c0_17 = arith.constant 0 : index
    %12 = vector.load %arg6[%c0_16, %c0_17] : memref<128x128xbf16, #tpu.memory_space<vmem>>, vector<128x128xbf16>
    %c0_18 = arith.constant 0 : index
    %c0_19 = arith.constant 0 : index
    %13 = vector.load %arg7[%c0_18, %c0_19] : memref<128x128xbf16, #tpu.memory_space<vmem>>, vector<128x128xbf16>
    %cst = arith.constant dense<0.000000e+00> : vector<16x128xf32>
    %14 = tpu.matmul %7, %10, %cst {dimension_numbers = #tpu.dot_dimension_numbers<[1], [0], [0], [1], [0, 0, 1, 1], [], []>} : vector<16x128xbf16>, vector<128x128xbf16>, vector<16x128xf32> -> vector<16x128xf32>
    %15 = vector.broadcast %0 : vector<1x128xf32> to vector<16x128xf32>
    %16 = arith.addf %14, %15 : vector<16x128xf32>
    %cst_20 = arith.constant dense<0.000000e+00> : vector<16x128xf32>
    %17 = tpu.matmul %8, %11, %cst_20 {dimension_numbers = #tpu.dot_dimension_numbers<[1], [0], [0], [1], [0, 0, 1, 1], [], []>} : vector<16x128xbf16>, vector<128x128xbf16>, vector<16x128xf32> -> vector<16x128xf32>
    %18 = vector.broadcast %1 : vector<1x128xf32> to vector<16x128xf32>
    %19 = arith.addf %17, %18 : vector<16x128xf32>
    %cst_21 = arith.constant dense<0.000000e+00> : vector<16x128xf32>
    %20 = tpu.matmul %9, %12, %cst_21 {dimension_numbers = #tpu.dot_dimension_numbers<[1], [0], [0], [1], [0, 0, 1, 1], [], []>} : vector<16x128xbf16>, vector<128x128xbf16>, vector<16x128xf32> -> vector<16x128xf32>
    %21 = vector.broadcast %2 : vector<1x128xf32> to vector<16x128xf32>
    %22 = arith.addf %20, %21 : vector<16x128xf32>
    %23 = vector.shape_cast %16 : vector<16x128xf32> to vector<2x8x128xf32>
    %24 = arith.truncf %23 : vector<2x8x128xf32> to vector<2x8x128xbf16>
    %25 = vector.shape_cast %19 : vector<16x128xf32> to vector<2x8x128xf32>
    %26 = arith.truncf %25 : vector<2x8x128xf32> to vector<2x8x128xbf16>
    %27 = vector.shape_cast %22 : vector<16x128xf32> to vector<2x8x128xf32>
    %28 = arith.truncf %27 : vector<2x8x128xf32> to vector<2x8x128xbf16>
    %29 = vector.extract_strided_slice %24 {offsets = [0, 0, 0], sizes = [2, 8, 32], strides = [1, 1, 1]} : vector<2x8x128xbf16> to vector<2x8x32xbf16>
    %30 = vector.extract_strided_slice %26 {offsets = [0, 0, 0], sizes = [2, 8, 32], strides = [1, 1, 1]} : vector<2x8x128xbf16> to vector<2x8x32xbf16>
    %31 = vector.extract_strided_slice %28 {offsets = [0, 0, 0], sizes = [2, 8, 32], strides = [1, 1, 1]} : vector<2x8x128xbf16> to vector<2x8x32xbf16>
    %cst_22 = arith.constant dense<0.000000e+00> : vector<2x8x8xf32>
    %32 = tpu.matmul %29, %30, %cst_22 {dimension_numbers = #tpu.dot_dimension_numbers<[2], [2], [1], [1], [0, 0, 0, 1, 1, 1], [0], [0]>} : vector<2x8x32xbf16>, vector<2x8x32xbf16>, vector<2x8x8xf32> -> vector<2x8x8xf32>
    %cst_23 = arith.constant 0.176776692 : f32
    %33 = vector.broadcast %cst_23 : f32 to vector<2x8x8xf32>
    %34 = arith.mulf %32, %33 : vector<2x8x8xf32>
    %cst_24 = arith.constant dense<0xFF800000> : vector<2x8xf32>
    %35 = vector.multi_reduction <maximumf>, %34, %cst_24 [2] : vector<2x8x8xf32> to vector<2x8xf32>
    %36 = vector.shape_cast %35 : vector<2x8xf32> to vector<2x8x1xf32>
    %37 = vector.broadcast %36 : vector<2x8x1xf32> to vector<2x8x8xf32>
    %38 = arith.subf %34, %37 : vector<2x8x8xf32>
    %39 = math.exp %38 : vector<2x8x8xf32>
    %cst_25 = arith.constant dense<0.000000e+00> : vector<2x8xf32>
    %40 = vector.multi_reduction <add>, %39, %cst_25 [2] : vector<2x8x8xf32> to vector<2x8xf32>
    %41 = vector.shape_cast %40 : vector<2x8xf32> to vector<2x8x1xf32>
    %42 = tpu.reciprocal %41 {approx = true} : vector<2x8x1xf32> -> vector<2x8x1xf32>
    %43 = vector.broadcast %42 : vector<2x8x1xf32> to vector<2x8x8xf32>
    %44 = arith.mulf %39, %43 : vector<2x8x8xf32>
    %45 = arith.truncf %44 : vector<2x8x8xf32> to vector<2x8x8xbf16>
    %cst_26 = arith.constant dense<0.000000e+00> : vector<2x8x32xf32>
    %46 = tpu.matmul %45, %31, %cst_26 {dimension_numbers = #tpu.dot_dimension_numbers<[2], [1], [1], [2], [0, 0, 0, 1, 1, 2], [0], [0]>} : vector<2x8x8xbf16>, vector<2x8x32xbf16>, vector<2x8x32xf32> -> vector<2x8x32xf32>
    %47 = vector.extract_strided_slice %24 {offsets = [0, 0, 32], sizes = [2, 8, 32], strides = [1, 1, 1]} : vector<2x8x128xbf16> to vector<2x8x32xbf16>
    %48 = vector.extract_strided_slice %26 {offsets = [0, 0, 32], sizes = [2, 8, 32], strides = [1, 1, 1]} : vector<2x8x128xbf16> to vector<2x8x32xbf16>
    %49 = vector.extract_strided_slice %28 {offsets = [0, 0, 32], sizes = [2, 8, 32], strides = [1, 1, 1]} : vector<2x8x128xbf16> to vector<2x8x32xbf16>
    %cst_27 = arith.constant dense<0.000000e+00> : vector<2x8x8xf32>
    %50 = tpu.matmul %47, %48, %cst_27 {dimension_numbers = #tpu.dot_dimension_numbers<[2], [2], [1], [1], [0, 0, 0, 1, 1, 1], [0], [0]>} : vector<2x8x32xbf16>, vector<2x8x32xbf16>, vector<2x8x8xf32> -> vector<2x8x8xf32>
    %cst_28 = arith.constant 0.176776692 : f32
    %51 = vector.broadcast %cst_28 : f32 to vector<2x8x8xf32>
    %52 = arith.mulf %50, %51 : vector<2x8x8xf32>
    %cst_29 = arith.constant dense<0xFF800000> : vector<2x8xf32>
    %53 = vector.multi_reduction <maximumf>, %52, %cst_29 [2] : vector<2x8x8xf32> to vector<2x8xf32>
    %54 = vector.shape_cast %53 : vector<2x8xf32> to vector<2x8x1xf32>
    %55 = vector.broadcast %54 : vector<2x8x1xf32> to vector<2x8x8xf32>
    %56 = arith.subf %52, %55 : vector<2x8x8xf32>
    %57 = math.exp %56 : vector<2x8x8xf32>
    %cst_30 = arith.constant dense<0.000000e+00> : vector<2x8xf32>
    %58 = vector.multi_reduction <add>, %57, %cst_30 [2] : vector<2x8x8xf32> to vector<2x8xf32>
    %59 = vector.shape_cast %58 : vector<2x8xf32> to vector<2x8x1xf32>
    %60 = tpu.reciprocal %59 {approx = true} : vector<2x8x1xf32> -> vector<2x8x1xf32>
    %61 = vector.broadcast %60 : vector<2x8x1xf32> to vector<2x8x8xf32>
    %62 = arith.mulf %57, %61 : vector<2x8x8xf32>
    %63 = arith.truncf %62 : vector<2x8x8xf32> to vector<2x8x8xbf16>
    %cst_31 = arith.constant dense<0.000000e+00> : vector<2x8x32xf32>
    %64 = tpu.matmul %63, %49, %cst_31 {dimension_numbers = #tpu.dot_dimension_numbers<[2], [1], [1], [2], [0, 0, 0, 1, 1, 2], [0], [0]>} : vector<2x8x8xbf16>, vector<2x8x32xbf16>, vector<2x8x32xf32> -> vector<2x8x32xf32>
    %65 = vector.extract_strided_slice %24 {offsets = [0, 0, 64], sizes = [2, 8, 32], strides = [1, 1, 1]} : vector<2x8x128xbf16> to vector<2x8x32xbf16>
    %66 = vector.extract_strided_slice %26 {offsets = [0, 0, 64], sizes = [2, 8, 32], strides = [1, 1, 1]} : vector<2x8x128xbf16> to vector<2x8x32xbf16>
    %67 = vector.extract_strided_slice %28 {offsets = [0, 0, 64], sizes = [2, 8, 32], strides = [1, 1, 1]} : vector<2x8x128xbf16> to vector<2x8x32xbf16>
    %cst_32 = arith.constant dense<0.000000e+00> : vector<2x8x8xf32>
    %68 = tpu.matmul %65, %66, %cst_32 {dimension_numbers = #tpu.dot_dimension_numbers<[2], [2], [1], [1], [0, 0, 0, 1, 1, 1], [0], [0]>} : vector<2x8x32xbf16>, vector<2x8x32xbf16>, vector<2x8x8xf32> -> vector<2x8x8xf32>
    %cst_33 = arith.constant 0.176776692 : f32
    %69 = vector.broadcast %cst_33 : f32 to vector<2x8x8xf32>
    %70 = arith.mulf %68, %69 : vector<2x8x8xf32>
    %cst_34 = arith.constant dense<0xFF800000> : vector<2x8xf32>
    %71 = vector.multi_reduction <maximumf>, %70, %cst_34 [2] : vector<2x8x8xf32> to vector<2x8xf32>
    %72 = vector.shape_cast %71 : vector<2x8xf32> to vector<2x8x1xf32>
    %73 = vector.broadcast %72 : vector<2x8x1xf32> to vector<2x8x8xf32>
    %74 = arith.subf %70, %73 : vector<2x8x8xf32>
    %75 = math.exp %74 : vector<2x8x8xf32>
    %cst_35 = arith.constant dense<0.000000e+00> : vector<2x8xf32>
    %76 = vector.multi_reduction <add>, %75, %cst_35 [2] : vector<2x8x8xf32> to vector<2x8xf32>
    %77 = vector.shape_cast %76 : vector<2x8xf32> to vector<2x8x1xf32>
    %78 = tpu.reciprocal %77 {approx = true} : vector<2x8x1xf32> -> vector<2x8x1xf32>
    %79 = vector.broadcast %78 : vector<2x8x1xf32> to vector<2x8x8xf32>
    %80 = arith.mulf %75, %79 : vector<2x8x8xf32>
    %81 = arith.truncf %80 : vector<2x8x8xf32> to vector<2x8x8xbf16>
    %cst_36 = arith.constant dense<0.000000e+00> : vector<2x8x32xf32>
    %82 = tpu.matmul %81, %67, %cst_36 {dimension_numbers = #tpu.dot_dimension_numbers<[2], [1], [1], [2], [0, 0, 0, 1, 1, 2], [0], [0]>} : vector<2x8x8xbf16>, vector<2x8x32xbf16>, vector<2x8x32xf32> -> vector<2x8x32xf32>
    %83 = vector.extract_strided_slice %24 {offsets = [0, 0, 96], sizes = [2, 8, 32], strides = [1, 1, 1]} : vector<2x8x128xbf16> to vector<2x8x32xbf16>
    %84 = vector.extract_strided_slice %26 {offsets = [0, 0, 96], sizes = [2, 8, 32], strides = [1, 1, 1]} : vector<2x8x128xbf16> to vector<2x8x32xbf16>
    %85 = vector.extract_strided_slice %28 {offsets = [0, 0, 96], sizes = [2, 8, 32], strides = [1, 1, 1]} : vector<2x8x128xbf16> to vector<2x8x32xbf16>
    %cst_37 = arith.constant dense<0.000000e+00> : vector<2x8x8xf32>
    %86 = tpu.matmul %83, %84, %cst_37 {dimension_numbers = #tpu.dot_dimension_numbers<[2], [2], [1], [1], [0, 0, 0, 1, 1, 1], [0], [0]>} : vector<2x8x32xbf16>, vector<2x8x32xbf16>, vector<2x8x8xf32> -> vector<2x8x8xf32>
    %cst_38 = arith.constant 0.176776692 : f32
    %87 = vector.broadcast %cst_38 : f32 to vector<2x8x8xf32>
    %88 = arith.mulf %86, %87 : vector<2x8x8xf32>
    %cst_39 = arith.constant dense<0xFF800000> : vector<2x8xf32>
    %89 = vector.multi_reduction <maximumf>, %88, %cst_39 [2] : vector<2x8x8xf32> to vector<2x8xf32>
    %90 = vector.shape_cast %89 : vector<2x8xf32> to vector<2x8x1xf32>
    %91 = vector.broadcast %90 : vector<2x8x1xf32> to vector<2x8x8xf32>
    %92 = arith.subf %88, %91 : vector<2x8x8xf32>
    %93 = math.exp %92 : vector<2x8x8xf32>
    %cst_40 = arith.constant dense<0.000000e+00> : vector<2x8xf32>
    %94 = vector.multi_reduction <add>, %93, %cst_40 [2] : vector<2x8x8xf32> to vector<2x8xf32>
    %95 = vector.shape_cast %94 : vector<2x8xf32> to vector<2x8x1xf32>
    %96 = tpu.reciprocal %95 {approx = true} : vector<2x8x1xf32> -> vector<2x8x1xf32>
    %97 = vector.broadcast %96 : vector<2x8x1xf32> to vector<2x8x8xf32>
    %98 = arith.mulf %93, %97 : vector<2x8x8xf32>
    %99 = arith.truncf %98 : vector<2x8x8xf32> to vector<2x8x8xbf16>
    %cst_41 = arith.constant dense<0.000000e+00> : vector<2x8x32xf32>
    %100 = tpu.matmul %99, %85, %cst_41 {dimension_numbers = #tpu.dot_dimension_numbers<[2], [1], [1], [2], [0, 0, 0, 1, 1, 2], [0], [0]>} : vector<2x8x8xbf16>, vector<2x8x32xbf16>, vector<2x8x32xf32> -> vector<2x8x32xf32>
    %101 = tpu.concatenate %46, %64, %82, %100 in 2 : vector<2x8x32xf32>, vector<2x8x32xf32>, vector<2x8x32xf32>, vector<2x8x32xf32> -> vector<2x8x128xf32>
    %102 = vector.shape_cast %101 : vector<2x8x128xf32> to vector<16x128xf32>
    %103 = arith.truncf %102 : vector<16x128xf32> to vector<16x128xbf16>
    %cst_42 = arith.constant dense<0.000000e+00> : vector<16x128xf32>
    %104 = tpu.matmul %103, %13, %cst_42 {dimension_numbers = #tpu.dot_dimension_numbers<[1], [0], [0], [1], [0, 0, 1, 1], [], []>} : vector<16x128xbf16>, vector<128x128xbf16>, vector<16x128xf32> -> vector<16x128xf32>
    %105 = vector.broadcast %3 : vector<1x128xf32> to vector<16x128xf32>
    %106 = arith.addf %104, %105 : vector<16x128xf32>
    %107 = arith.addf %6, %106 : vector<16x128xf32>
    %cst_43 = arith.constant dense<0.000000e+00> : vector<16xf32>
    %108 = vector.multi_reduction <add>, %107, %cst_43 [1] : vector<16x128xf32> to vector<16xf32>
    %109 = vector.shape_cast %108 : vector<16xf32> to vector<16x1xf32>
    %cst_44 = arith.constant 1.280000e+02 : f32
    %110 = vector.broadcast %cst_44 : f32 to vector<16x1xf32>
    %111 = arith.divf %109, %110 : vector<16x1xf32>
    %112 = vector.broadcast %111 : vector<16x1xf32> to vector<16x128xf32>
    %113 = arith.subf %107, %112 : vector<16x128xf32>
    %114 = arith.mulf %113, %113 : vector<16x128xf32>
    %cst_45 = arith.constant dense<0.000000e+00> : vector<16xf32>
    %115 = vector.multi_reduction <add>, %114, %cst_45 [1] : vector<16x128xf32> to vector<16xf32>
    %116 = vector.shape_cast %115 : vector<16xf32> to vector<16x1xf32>
    %cst_46 = arith.constant 1.280000e+02 : f32
    %117 = vector.broadcast %cst_46 : f32 to vector<16x1xf32>
    %118 = arith.divf %116, %117 : vector<16x1xf32>
    %cst_47 = arith.constant 9.99999974E-6 : f32
    %119 = vector.broadcast %cst_47 : f32 to vector<16x1xf32>
    %120 = arith.addf %118, %119 : vector<16x1xf32>
    %121 = math.rsqrt %120 : vector<16x1xf32>
    %122 = vector.broadcast %121 : vector<16x1xf32> to vector<16x128xf32>
    %123 = arith.mulf %113, %122 : vector<16x128xf32>
    %124 = vector.broadcast %4 : vector<1x128xf32> to vector<16x128xf32>
    %125 = arith.mulf %123, %124 : vector<16x128xf32>
    %126 = vector.broadcast %5 : vector<1x128xf32> to vector<16x128xf32>
    %127 = arith.addf %125, %126 : vector<16x128xf32>
    %c0_48 = arith.constant 0 : index
    %c0_49 = arith.constant 0 : index
    %128 = vector.load %arg9[%c0_48, %c0_49] : memref<16x128xf32, #tpu.memory_space<vmem>>, vector<16x128xf32>
    tpu.vector_store %arg9[%c0_48, %c0_49], %127 {strides = array<i32>} : memref<16x128xf32, #tpu.memory_space<vmem>>, vector<16x128xf32>,
    return
  }
  func.func @transform_0(%arg0: i32) -> (i32, i32) {
    %c0_i32 = arith.constant 0 : i32
    %c0_i32_0 = arith.constant 0 : i32
    return %arg0, %c0_i32 : i32, i32
  }
  func.func @transform_1(%arg0: i32) -> (i32, i32) {
    %c0_i32 = arith.constant 0 : i32
    %c0_i32_0 = arith.constant 0 : i32
    return %arg0, %c0_i32 : i32, i32
  }
  func.func @transform_2(%arg0: i32) -> (i32, i32) {
    %c0_i32 = arith.constant 0 : i32
    %c0_i32_0 = arith.constant 0 : i32
    return %arg0, %c0_i32 : i32, i32
  }
  func.func @transform_3(%arg0: i32) -> (i32, i32) {
    %c0_i32 = arith.constant 0 : i32
    %c0_i32_0 = arith.constant 0 : i32
    %c0_i32_1 = arith.constant 0 : i32
    return %c0_i32, %c0_i32_0 : i32, i32
  }
  func.func @transform_4(%arg0: i32) -> (i32, i32) {
    %c0_i32 = arith.constant 0 : i32
    %c0_i32_0 = arith.constant 0 : i32
    %c0_i32_1 = arith.constant 0 : i32
    return %c0_i32, %c0_i32_0 : i32, i32
  }
  func.func @transform_5(%arg0: i32) -> (i32, i32) {
    %c0_i32 = arith.constant 0 : i32
    %c0_i32_0 = arith.constant 0 : i32
    %c0_i32_1 = arith.constant 0 : i32
    return %c0_i32, %c0_i32_0 : i32, i32
  }
  func.func @transform_6(%arg0: i32) -> (i32, i32) {
    %c0_i32 = arith.constant 0 : i32
    %c0_i32_0 = arith.constant 0 : i32
    %c0_i32_1 = arith.constant 0 : i32
    return %c0_i32, %c0_i32_0 : i32, i32
  }
  func.func @transform_7(%arg0: i32) -> (i32, i32) {
    %c0_i32 = arith.constant 0 : i32
    %c0_i32_0 = arith.constant 0 : i32
    %c0_i32_1 = arith.constant 0 : i32
    return %c0_i32, %c0_i32_0 : i32, i32
  }
  func.func @transform_8(%arg0: i32) -> (i32, i32) {
    %c0_i32 = arith.constant 0 : i32
    %c0_i32_0 = arith.constant 0 : i32
    return %arg0, %c0_i32 : i32, i32
  }
}

</mosaic_0001>

<bundles_post_ra>
// kernel: tpu_custom_call.1
= control target key start
LH: loop header
LB: loop body
LE: loop exit
PB: predicated region body
PF: predicated region fallthrough
CT: control target
= control target key end

     0   :  { %13 = vsyncpa [#allocation3], 0  ;;  %s2581_s0 = inlined_call_operand.hbm [shape: f32[16,128], index: 0, kind: input, shape index: {}]   ;;  %s2582_s1 = inlined_call_operand.hbm [shape: bf16[16,128], index: 1, kind: input, shape index: {}]   ;;  %s2583_s2 = inlined_call_operand.hbm [shape: bf16[16,128], index: 2, kind: input, shape index: {}]   ;;  %s2584_s3 = inlined_call_operand.hbm [shape: bf16[128,128], index: 3, kind: input, shape index: {}]   ;;  %s2585_s4 = inlined_call_operand.hbm [shape: bf16[128,128], index: 4, kind: input, shape index: {}]   ;;  %s2586_s5 = inlined_call_operand.hbm [shape: bf16[128,128], index: 5, kind: input, shape index: {}]   ;;  %s2587_s6 = inlined_call_operand.hbm [shape: bf16[128,128], index: 6, kind: input, shape index: {}]   ;;  %s2588_s7 = inlined_call_operand.vmem [shape: f32[8,128], index: 7, kind: input, shape index: {}]   ;;  %s2589_s8 = inlined_call_operand.hbm [shape: f32[16,128], index: 8, kind: output, shape index: {}]  }
   0x1   :  { %14 = vsyncpa [#allocation6], 0 }
   0x2   :  { %15 = vsyncpa [#allocation9], 0 }
   0x3   :  { %16 = vsyncpa [#allocation12], 0 }
   0x4   :  { %17 = vsyncpa [#allocation4], 0  ;;  %s2157_s27 = smov [#allocation5]   ;;  %s1971_s9 = scalar_lea.hbm %s2582_s1, 128 }
   0x5   :  { %s35_s28 = sshll.u32 %s2157_s27, 4  ;;  %p1972_p0 = scmp.ne.s32.totalorder %s2582_s1, %s1971_s9  ;;  %s36_s28 = int_to_ptr.vmem [resolvable:$true] %s35_s28 }
   0x6   :  { %p1975_p1 = scmp.lt.u32.totalorder %s1971_s9, %s2582_s1 }
   0x8   :  { %p1977_p2 = pnand %p1975_p1, %p1972_p0 }
   0xa   :  { %1980 = shalt.err (!%p1977_p2)
}
   0xb   :  { %s1981_s14 = scalar_lea.vmem %s36_s28, 128  ;;  %p1986_p4 = scmp.lt.s32.totalorder %s36_s28, %s36_s28 }
   0xc   :  { %p1982_p3 = scmp.ne.s32.totalorder %s36_s28, %s1981_s14  ;;  %p1987_p5 = scmp.lt.s32.totalorder %s1981_s14, %s1981_s14 }
   0xe   :  { %p1988_p6 = por %p1987_p5, %p1986_p4 }
  0x10   :  { %p1989_p7 = pnand %p1988_p6, %p1982_p3 }
  0x12   :  { %1992 = shalt.err (!%p1989_p7)
}
  0x13   :  { %s2158_s15 = smov 64   ;;  %s2159_s16 = smov 4  }
  0x14   :  { %41 = dma.hbm_to_vmem [thread:$0]  %s2582_s1, 128, %s36_s28, [#allocation6], %s2158_s15, %s2158_s15, %s2159_s16  }
  0x15   :  { %s2160_s19 = smov [#allocation8]   ;;  %s2161_s21 = smov [#allocation11]  }
  0x16   :  { %s59_s20 = sshll.u32 %s2160_s19, 4  ;;  %s83_s22 = sshll.u32 %s2161_s21, 4  ;;  %s60_s20 = int_to_ptr.vmem [resolvable:$true] %s59_s20  ;;  %s84_s22 = int_to_ptr.vmem [resolvable:$true] %s83_s22 }
  0x17   :  { %s1993_s25 = scalar_lea.hbm %s2584_s3, 1024 }
  0x18   :  { %p1994_p8 = scmp.ne.s32.totalorder %s2584_s3, %s1993_s25  ;;  %p1997_p9 = scmp.lt.u32.totalorder %s1993_s25, %s2584_s3 }
  0x1a   :  { %p1999_p10 = pnand %p1997_p9, %p1994_p8 }
  0x1c   :  { %2002 = shalt.err (!%p1999_p10)
}
  0x1d   :  { %s2003_s1 = scalar_lea.vmem %s60_s20, 1024  ;;  %p2008_p12 = scmp.lt.s32.totalorder %s60_s20, %s60_s20 }
  0x1e   :  { %p2004_p11 = scmp.ne.s32.totalorder %s60_s20, %s2003_s1  ;;  %p2009_p13 = scmp.lt.s32.totalorder %s2003_s1, %s2003_s1 }
  0x20   :  { %p2010_p0 = por %p2009_p13, %p2008_p12 }
  0x22   :  { %p2011_p1 = pnand %p2010_p0, %p2004_p11 }
  0x24   :  { %2014 = shalt.err (!%p2011_p1)
}
  0x25   :  { %65 = dma.hbm_to_vmem [thread:$0]  %s2584_s3, 1024, %s60_s20, [#allocation9], %s2158_s15, %s2158_s15, %s2159_s16  }
  0x26   :  { %s2015_s12 = scalar_lea.hbm %s2586_s5, 1024 }
  0x27   :  { %p2016_p2 = scmp.ne.s32.totalorder %s2586_s5, %s2015_s12  ;;  %p2019_p3 = scmp.lt.u32.totalorder %s2015_s12, %s2586_s5 }
  0x29   :  { %p2021_p4 = pnand %p2019_p3, %p2016_p2 }
  0x2b   :  { %2024 = shalt.err (!%p2021_p4)
}
  0x2c   :  { %s2025_s19 = scalar_lea.vmem %s84_s22, 1024  ;;  %p2030_p6 = scmp.lt.s32.totalorder %s84_s22, %s84_s22 }
  0x2d   :  { %p2026_p5 = scmp.ne.s32.totalorder %s84_s22, %s2025_s19  ;;  %p2031_p7 = scmp.lt.s32.totalorder %s2025_s19, %s2025_s19 }
  0x2f   :  { %p2032_p8 = por %p2031_p7, %p2030_p6 }
  0x31   :  { %p2033_p9 = pnand %p2032_p8, %p2026_p5 }
  0x33   :  { %2036 = shalt.err (!%p2033_p9)
}
  0x34   :  { %89 = dma.hbm_to_vmem [thread:$0]  %s2586_s5, 1024, %s84_s22, [#allocation12], %s2158_s15, %s2158_s15, %s2159_s16  }
  0x35   :  { %s2162_s21 = smov [#allocation2]   ;;  %s2037_s26 = scalar_lea.hbm %s2581_s0, 256 }
  0x36   :  { %s23_s23 = sshll.u32 %s2162_s21, 4  ;;  %p2038_p10 = scmp.ne.s32.totalorder %s2581_s0, %s2037_s26  ;;  %s24_s23 = int_to_ptr.vmem [resolvable:$true] %s23_s23 }
  0x37   :  { %p2041_p11 = scmp.lt.u32.totalorder %s2037_s26, %s2581_s0 }
  0x39   :  { %p2043_p12 = pnand %p2041_p11, %p2038_p10 }
  0x3b   :  { %2046 = shalt.err (!%p2043_p12)
}
  0x3c   :  { %s2047_s28 = scalar_lea.vmem %s24_s23, 256  ;;  %p2052_p0 = scmp.lt.s32.totalorder %s24_s23, %s24_s23 }
  0x3d   :  { %p2048_p13 = scmp.ne.s32.totalorder %s24_s23, %s2047_s28  ;;  %p2053_p1 = scmp.lt.s32.totalorder %s2047_s28, %s2047_s28 }
  0x3f   :  { %p2054_p2 = por %p2053_p1, %p2052_p0 }
  0x41   :  { %p2055_p3 = pnand %p2054_p2, %p2048_p13 }
  0x43   :  { %2058 = shalt.err (!%p2055_p3)
}
  0x44   :  { %s2163_s5 = smov 128   ;;  %s2164_s22 = smov 8  }
  0x45   :  { %29 = dma.hbm_to_vmem [thread:$0]  %s2581_s0, 256, %s24_s23, [#allocation3], %s2163_s5, %s2163_s5, %s2164_s22  }
  0x46   :  { %s2165_s11 = smov [#allocation7]   ;;  %s2166_s13 = smov [#allocation10]  }
  0x47   :  { %s47_s12 = sshll.u32 %s2165_s11, 4  ;;  %s71_s14 = sshll.u32 %s2166_s13, 4  ;;  %s48_s12 = int_to_ptr.vmem [resolvable:$true] %s47_s12  ;;  %s2278_s14 = int_to_ptr.vmem [resolvable:$true] %s71_s14 }
  0x48   :  { %s2059_s19 = scalar_lea.hbm %s2583_s2, 128 }
  0x49   :  { %p2060_p4 = scmp.ne.s32.totalorder %s2583_s2, %s2059_s19  ;;  %p2063_p5 = scmp.lt.u32.totalorder %s2059_s19, %s2583_s2 }
  0x4b   :  { %p2065_p6 = pnand %p2063_p5, %p2060_p4 }
  0x4d   :  { %2068 = shalt.err (!%p2065_p6)
}
  0x4e   :  { %s2069_s0 = scalar_lea.vmem %s48_s12, 128  ;;  %p2074_p8 = scmp.lt.s32.totalorder %s48_s12, %s48_s12 }
  0x4f   :  { %p2070_p7 = scmp.ne.s32.totalorder %s48_s12, %s2069_s0  ;;  %p2075_p9 = scmp.lt.s32.totalorder %s2069_s0, %s2069_s0 }
  0x51   :  { %p2076_p10 = por %p2075_p9, %p2074_p8 }
  0x53   :  { %p2077_p11 = pnand %p2076_p10, %p2070_p7 }
  0x55   :  { %2080 = shalt.err (!%p2077_p11)
}
  0x56   :  { %53 = dma.hbm_to_vmem [thread:$0]  %s2583_s2, 128, %s48_s12, [#allocation6], %s2158_s15, %s2158_s15, %s2159_s16  }
  0x57   :  { %s2081_s29 = scalar_lea.hbm %s2585_s4, 1024 }
  0x58   :  { %p2082_p12 = scmp.ne.s32.totalorder %s2585_s4, %s2081_s29  ;;  %p2085_p13 = scmp.lt.u32.totalorder %s2081_s29, %s2585_s4 }
  0x5a   :  { %p2087_p0 = pnand %p2085_p13, %p2082_p12 }
  0x5c   :  { %2090 = shalt.err (!%p2087_p0)
}
  0x5d   :  { %s2091_s10 = scalar_lea.vmem %s2278_s14, 1024  ;;  %p2096_p2 = scmp.lt.s32.totalorder %s2278_s14, %s2278_s14 }
  0x5e   :  { %p2092_p1 = scmp.ne.s32.totalorder %s2278_s14, %s2091_s10  ;;  %p2097_p3 = scmp.lt.s32.totalorder %s2091_s10, %s2091_s10 }
  0x60   :  { %p2098_p4 = por %p2097_p3, %p2096_p2 }
  0x62   :  { %p2099_p5 = pnand %p2098_p4, %p2092_p1 }
  0x64   :  { %2102 = shalt.err (!%p2099_p5)
}
  0x65   :  { %77 = dma.hbm_to_vmem [thread:$0]  %s2585_s4, 1024, %s2278_s14, [#allocation9], %s2158_s15, %s2158_s15, %s2159_s16  }
  0x66   :  { %s2167_s12 = smov [#allocation13]   ;;  %s2103_s19 = scalar_lea.hbm %s2587_s6, 1024 }
  0x67   :  { %s95_s13 = sshll.u32 %s2167_s12, 4  ;;  %p2104_p6 = scmp.ne.s32.totalorder %s2587_s6, %s2103_s19  ;;  %s96_s13 = int_to_ptr.vmem [resolvable:$true] %s95_s13 }
  0x68   :  { %p2107_p7 = scmp.lt.u32.totalorder %s2103_s19, %s2587_s6 }
  0x6a   :  { %p2109_p8 = pnand %p2107_p7, %p2104_p6 }
  0x6c   :  { %2112 = shalt.err (!%p2109_p8)
}
  0x6d   :  { %s2113_s0 = scalar_lea.vmem %s96_s13, 1024  ;;  %p2118_p10 = scmp.lt.s32.totalorder %s96_s13, %s96_s13 }
  0x6e   :  { %p2114_p9 = scmp.ne.s32.totalorder %s96_s13, %s2113_s0  ;;  %p2119_p11 = scmp.lt.s32.totalorder %s2113_s0, %s2113_s0 }
  0x70   :  { %p2120_p12 = por %p2119_p11, %p2118_p10 }
  0x72   :  { %p2121_p13 = pnand %p2120_p12, %p2114_p9 }
  0x74   :  { %2124 = shalt.err (!%p2121_p13)
}
  0x75   :  { %101 = dma.hbm_to_vmem [thread:$0]  %s2587_s6, 1024, %s96_s13, [#allocation12], %s2158_s15, %s2158_s15, %s2159_s16  }
  0x76   :  { %2147 = dma.done.wait [#allocation3], 256  }
  0x77   :  { %2148 = vsyncadd [#allocation3], 4294967040 }
  0x78   :  { %2149 = dma.done.wait [#allocation6], 256  }
  0x79   :  { %2150 = vsyncadd [#allocation6], 4294967040 }
  0x7a   :  { %2151 = dma.done.wait [#allocation9], 2048  }
  0x7b   :  { %2152 = vsyncadd [#allocation9], 4294965248 }
  0x7c   :  { %2153 = dma.done.wait [#allocation12], 2048  }
  0x7d   :  { %2154 = vsyncadd [#allocation12], 4294965248  ;;  %v2168_v0 = vmov 0.0   ;;  %vm2169_vm0 = vmmov 0   ;;  %v1901_v1 = vld [vmem:[#allocation10] sm:$0xff]   ;;  %v1902_v2 = vld [vmem:[#allocation10 + $0x8] sm:$0xff]  }
  0x7e   :  { %1714 = vmatprep.subr.bf16.mxu1 %v2168_v0  ;;  %1694 = vmatprep.subr.bf16.mxu0 %v2168_v0  ;;  %v1903_v3 = vld [vmem:[#allocation8] sm:$0xff]   ;;  %v1905_v4 = vld [vmem:[#allocation8 + $0x8] sm:$0xff]   ;;  %v1904_v5 = vld [vmem:[#allocation10 + $0x10] sm:$0xff]   ;;  %vm500_vm1 = vcmask 261120   ;;  %vm595_vm2 = vcmask 64512   ;;  %s2170_s26 = smov 96  }
  0x7f   :  { %1730 = vmatprep.mubr.msk.bf16.mxu1 %vm2169_vm0, %v2168_v0  ;;  %1710 = vmatprep.mubr.msk.bf16.mxu0 %vm2169_vm0, %v2168_v0  ;;  %v1907_v6 = vld [vmem:[#allocation8 + $0x10] sm:$0xff]   ;;  %v1906_v7 = vld [vmem:[#allocation10 + $0x18] sm:$0xff]   ;;  %v1908_v9 = vld [vmem:[#allocation10 + $0x20] sm:$0xff]   ;;  %vm623_vm3 = vcmask 1043456   ;;  %s2171_s30 = smov 32   ;;  %vm1411_vm4 = vcmask 523264  }
  0x80   :  { %1715 = vmatpush3.bf16.msra.mxu1 %v1901_v1  ;;  %1695 = vmatpush3.bf16.msra.mxu0 %v1903_v3  ;;  %v1909_v8 = vld [vmem:[#allocation8 + $0x18] sm:$0xff]   ;;  %v1911_v10 = vld [vmem:[#allocation8 + $0x20] sm:$0xff]   ;;  %v1910_v11 = vld [vmem:[#allocation10 + $0x28] sm:$0xff]   ;;  %vm1414_vm5 = vcmask 785408   ;;  %s2172_s11 = smov [#allocation14]  }
  0x81   :  { %1716 = vmatprep.subr.bf16.mxu1 %v2168_v0  ;;  %1696 = vmatprep.subr.bf16.mxu0 %v2168_v0  ;;  %v1913_v12 = vld [vmem:[#allocation8 + $0x28] sm:$0xff]   ;;  %v1912_v13 = vld [vmem:[#allocation10 + $0x30] sm:$0xff]   ;;  %v1914_v15 = vld [vmem:[#allocation10 + $0x38] sm:$0xff]   ;;  %s1555_s12 = sshll.u32 %s2172_s11, 4  ;;  %s1556_s12 = int_to_ptr.vmem [resolvable:$true] %s1555_s12 }
  0x82   :  { %v1915_v14 = vld [vmem:[#allocation8 + $0x30] sm:$0xff]   ;;  %v1917_v16 = vld [vmem:[#allocation8 + $0x38] sm:$0xff]   ;;  %v2348_v17 = vld [vmem:[#allocation2] sm:$0xff]  ;;  %s2125_s13 = scalar_lea.vmem %s1556_s12, 256  ;;  %p2130_p1 = scmp.lt.s32.totalorder %s1556_s12, %s1556_s12 }
  0x83   :  { %v2350_v18 = vld [vmem:[#allocation2 + $0x8] sm:$0xff]  ;;  %v1916_v19 = vld [vmem:[#allocation5] sm:$0xff]   ;;  %v1579_v21 = vld [vmem:[%s2588_s7 + $0x1] ss:$0 sm:$0xff]  ;;  %p2126_p0 = scmp.ne.s32.totalorder %s1556_s12, %s2125_s13  ;;  %p2131_p2 = scmp.lt.s32.totalorder %s2125_s13, %s2125_s13 }
  0x84   :  { %1717 = vmatpush3.bf16.msra.mxu1 %v1902_v2  ;;  %1697 = vmatpush3.bf16.msra.mxu0 %v1905_v4  ;;  %v134_v20 = vpack.c.bf16 %v2350_v18, %v2348_v17  ;;  %v1570_v26 = vld [vmem:[%s2588_s7] ss:$0 sm:$0xff]  ;;  %v1919_v42 = vld [vmem:[#allocation11 + $0x8] sm:$0xff]   ;;  %v1920_v43 = vld [vmem:[#allocation11 + $0x10] sm:$0xff]  }
  0x85   :  { %1718 = vmatprep.subr.bf16.mxu1 %v2168_v0  ;;  %1698 = vmatprep.subr.bf16.mxu0 %v2168_v0  ;;  %v1918_v41 = vld [vmem:[#allocation11] sm:$0xff]   ;;  %v1921_v44 = vld [vmem:[#allocation11 + $0x18] sm:$0xff]   ;;  %v1923_v46 = vld [vmem:[#allocation11 + $0x28] sm:$0xff]   ;;  %p2132_p3 = por %p2131_p2, %p2130_p1 }
  0x86   :  { %v1922_v45 = vld [vmem:[#allocation11 + $0x20] sm:$0xff]   ;;  %v1924_v47 = vld [vmem:[#allocation11 + $0x30] sm:$0xff]   ;;  %v1925_v48 = vld [vmem:[#allocation11 + $0x38] sm:$0xff]  }
  0x87   :  { %v1926_v49 = vld [vmem:[#allocation7] sm:$0xff]   ;;  %p2133_p4 = pnand %p2132_p3, %p2126_p0 }
  0x88   :  { %1719 = vmatpush3.bf16.msra.mxu1 %v1904_v5  ;;  %1699 = vmatpush3.bf16.msra.mxu0 %v1907_v6 }
  0x89   :  { %1720 = vmatprep.subr.bf16.mxu1 %v2168_v0  ;;  %1700 = vmatprep.subr.bf16.mxu0 %v2168_v0 }
  0x8c   :  { %1721 = vmatpush3.bf16.msra.mxu1 %v1906_v7  ;;  %1701 = vmatpush3.bf16.msra.mxu0 %v1909_v8 }
  0x8d   :  { %1722 = vmatprep.subr.bf16.mxu1 %v2168_v0  ;;  %1702 = vmatprep.subr.bf16.mxu0 %v2168_v0 }
  0x90   :  { %1723 = vmatpush3.bf16.msra.mxu1 %v1908_v9  ;;  %1703 = vmatpush3.bf16.msra.mxu0 %v1911_v10 }
  0x91   :  { %1724 = vmatprep.subr.bf16.mxu1 %v2168_v0  ;;  %1704 = vmatprep.subr.bf16.mxu0 %v2168_v0 }
  0x94   :  { %1725 = vmatpush3.bf16.msra.mxu1 %v1910_v11  ;;  %1705 = vmatpush3.bf16.msra.mxu0 %v1913_v12  ;;  %v1589_v12 = vld [vmem:[%s2588_s7 + $0x2] ss:$0 sm:$0xff] }
  0x95   :  { %1726 = vmatprep.subr.bf16.mxu1 %v2168_v0  ;;  %1706 = vmatprep.subr.bf16.mxu0 %v2168_v0 }
  0x98   :  { %1727 = vmatpush3.bf16.msra.mxu1 %v1912_v13  ;;  %1707 = vmatpush3.bf16.msra.mxu0 %v1915_v14 }
  0x99   :  { %1728 = vmatprep.subr.bf16.mxu1 %v2168_v0  ;;  %1708 = vmatprep.subr.bf16.mxu0 %v2168_v0 }
  0x9c   :  { %1729 = vmatpush3.bf16.msra.mxu1 %v1914_v15  ;;  %1709 = vmatpush3.bf16.msra.mxu0 %v1917_v16 }
  0x9d   :  { %1754 = vmatprep.subr.bf16.mxu1 %v2168_v0  ;;  %1734 = vmatprep.subr.bf16.mxu0 %v2168_v0 }
  0x9f   :  { %1731 = vmatmul.mubr.bf16.vlgmr.msra.gmra.mrb[0].mxu1 %v1916_v19  ;;  %1711 = vmatmul.mubr.bf16.vlgmr.msra.gmra.mrb[0].mxu0 %v134_v20 }
  0xa0   :  { %1756 = vmatprep.mubr.msk.bf16.mxu1 %vm2169_vm0, %v2168_v0  ;;  %1750 = vmatprep.mubr.msk.bf16.mxu0 %vm2169_vm0, %v2168_v0 }
  0xa1   :  { %1735 = vmatpush3.bf16.msra.mxu0 %v1918_v41 }
  0xa2   :  { %1736 = vmatprep.subr.bf16.mxu0 %v2168_v0 }
  0xa5   :  { %1737 = vmatpush3.bf16.msra.mxu0 %v1919_v42 }
  0xa6   :  { %1738 = vmatprep.subr.bf16.mxu0 %v2168_v0 }
  0xa9   :  { %1739 = vmatpush3.bf16.msra.mxu0 %v1920_v43 }
  0xaa   :  { %1740 = vmatprep.subr.bf16.mxu0 %v2168_v0 }
  0xad   :  { %1741 = vmatpush3.bf16.msra.mxu0 %v1921_v44 }
  0xae   :  { %1742 = vmatprep.subr.bf16.mxu0 %v2168_v0 }
  0xb1   :  { %1743 = vmatpush3.bf16.msra.mxu0 %v1922_v45 }
  0xb2   :  { %1744 = vmatprep.subr.bf16.mxu0 %v2168_v0 }
  0xb5   :  { %1745 = vmatpush3.bf16.msra.mxu0 %v1923_v46 }
  0xb6   :  { %1746 = vmatprep.subr.bf16.mxu0 %v2168_v0 }
  0xb9   :  { %1747 = vmatpush3.bf16.msra.mxu0 %v1924_v47 }
  0xba   :  { %1748 = vmatprep.subr.bf16.mxu0 %v2168_v0 }
  0xbd   :  { %1749 = vmatpush3.bf16.msra.mxu0 %v1925_v48 }
  0xbe   :  { %1802 = vmatprep.subr.bf16.mxu0 %v2168_v0 }
  0xc0   :  { %1751 = vmatmul.mubr.bf16.vlgmr.msra.gmra.mrb[4].mxu0 %v1926_v49 }
  0xc1   :  { %1804 = vmatprep.mubr.msk.bf16.mxu0 %vm2169_vm0, %v2168_v0 }
 0x172   :  { %v388_v22 = vpop.f32.mrb[0].mxu1  ;;  %v289_v27 = vpop.f32.mrb[0].mxu0 }
 0x173   :  { %v389_v23 = vadd.f32 %v1579_v21, %v388_v22  ;;  %v1732_v24 = vpop.f32.mrb[1].mxu1  ;;  %v1712_v30 = vpop.f32.mrb[1].mxu0  ;;  %v290_v33 = vadd.f32 %v1570_v26, %v289_v27 }
 0x174   :  { %v391_v25 = vpop.f32.mrb[2].mxu1  ;;  %v292_v31 = vpop.f32.mrb[2].mxu0 }
 0x175   :  { %v2368_v28 = vpack.c.bf16 %v389_v23, %v389_v23  ;;  %v1733_v29 = vpop.f32.mrb[3].mxu1  ;;  %v392_v32 = vadd.f32 %v1579_v21, %v391_v25  ;;  %v1713_v35 = vpop.f32.mrb[3].mxu0  ;;  %v2375_v37 = vpack.c.bf16 %v290_v33, %v290_v33  ;;  %v293_v39 = vadd.f32 %v1570_v26, %v292_v31 }
 0x177   :  { %v505_v34 = vsel %vm500_vm1, %v2368_v28, 0  ;;  %v2373_v36 = vpack.c.bf16 %v392_v32, %v392_v32  ;;  %v2384_v40 = vpack.c.bf16 %v293_v39, %v293_v39 }
 0x178   :  { %1755 = vmatpush3.bf16.xpose.msra.mxu1 %v505_v34 }
 0x179   :  { %1760 = vmatprep.subr.bf16.mxu1 %v2168_v0  ;;  %v551_v38 = vsel %vm500_vm1, %v2373_v36, 0 }
 0x17f   :  { %1757 = vmatmul.mubr.msk.bf16.vlgmr.msra.gmra.mrb[4].mxu1 %vm500_vm1, %v2375_v37 }
 0x180   :  { %1761 = vmatpush3.bf16.xpose.msra.mxu1 %v551_v38  ;;  %1762 = vmatprep.mubr.msk.bf16.mxu1 %vm2169_vm0, %v2168_v0 }
 0x181   :  { %1766 = vmatprep.subr.bf16.mxu1 %v2168_v0 }
 0x187   :  { %1763 = vmatmul.mubr.msk.bf16.vlgmr.msra.gmra.mrb[8].mxu1 %vm500_vm1, %v2384_v40 }
 0x188   :  { %1768 = vmatprep.mubr.msk.bf16.mxu1 %vm2169_vm0, %v2168_v0 }
 0x193   :  { %v487_v9 = vpop.f32.mrb[4].mxu0 }
 0x194   :  { %v1752_v10 = vpop.f32.mrb[5].mxu0  ;;  %v488_v14 = vadd.f32 %v1589_v12, %v487_v9 }
 0x195   :  { %v490_v11 = vpop.f32.mrb[6].mxu0 }
 0x196   :  { %v1753_v13 = vpop.f32.mrb[7].mxu0  ;;  %v491_v15 = vadd.f32 %v1589_v12, %v490_v11  ;;  %v2409_v16 = vpack.c.bf16 %v488_v14, %v488_v14 }
 0x198   :  { %v625_v19 = vsel %vm623_vm3, %v2409_v16, 0  ;;  %v2420_v24 = vpack.c.bf16 %v491_v15, %v491_v15 }
 0x199   :  { %1767 = vmatpush3.bf16.msra.mxu1 %v625_v19 }
 0x19a   :  { %1772 = vmatprep.subr.bf16.mxu1 %v2168_v0  ;;  %v671_v26 = vsel %vm623_vm3, %v2420_v24, 0 }
 0x252   :  { %v541_v50 = vpop.f32.mrb[4].mxu1 }
 0x253   :  { %v593_v51 = vmul.f32 0.17677669, %v541_v50  ;;  %v1758_v52 = vpop.f32.mrb[5].mxu1 }
 0x254   :  { %v544_v53 = vpop.f32.mrb[6].mxu1 }
 0x255   :  { %v1759_v54 = vpop.f32.mrb[7].mxu1  ;;  %v596_v55 = vsel %vm595_vm2, %v593_v51, -inf }
 0x256   :  { %597 = vmax.xlane.f32.xlu0 %v596_v55 }
 0x25a   :  { %v587_v56 = vpop.f32.mrb[8].mxu1 }
 0x25b   :  { %v594_v57 = vmul.f32 0.17677669, %v587_v56  ;;  %v1764_v58 = vpop.f32.mrb[9].mxu1 }
 0x25c   :  { %v590_v59 = vpop.f32.mrb[10].mxu1 }
 0x25d   :  { %v1765_v60 = vpop.f32.mrb[11].mxu1  ;;  %v599_v61 = vsel %vm595_vm2, %v594_v57, -inf }
 0x25e   :  { %600 = vmax.xlane.f32.xlu0 %v599_v61 }
 0x274   :  { %717 = vrot.lane.b32.xlu0 %v2368_v28, %s2170_s26 }
 0x2e3   :  { %v598_v62 = vpop.xlane.xlu0 %597 }
 0x2e4   :  { %v602_v63 = vsub.f32 %v593_v51, %v598_v62 }
 0x2e6   :  { %v604_v1 = vmul.f32 1.442695, %v602_v63 }
 0x2e8   :  { %1935 = vpow2.f32 %v604_v1 }
 0x2eb   :  { %v601_v2 = vpop.xlane.xlu0 %600 }
 0x2ec   :  { %v603_v3 = vsub.f32 %v594_v57, %v601_v2 }
 0x2ee   :  { %v606_v4 = vmul.f32 1.442695, %v603_v3 }
 0x2ef   :  { %v718_v30 = vpop.permute.xlu0 %717 }
 0x2f0   :  { %1937 = vpow2.f32 %v606_v4  ;;  %v723_v33 = vsel %vm500_vm1, %v718_v30, 0 }
 0x2f2   :  { %v1936_v5 = vpop.eup %1935 }
 0x2f3   :  { %v608_v6 = vsel %vm595_vm2, %v1936_v5, 0.0 }
 0x2f4   :  { %609 = vadd.xlane.f32.xlu1 %v608_v6 }
 0x2fa   :  { %v1938_v7 = vpop.eup %1937 }
 0x2fb   :  { %v611_v8 = vsel %vm595_vm2, %v1938_v7, 0.0 }
 0x2fc   :  { %612 = vadd.xlane.f32.xlu1 %v611_v8 }
 0x30d   :  { %714 = vrot.lane.b32.xlu1 %v2375_v37, %s2170_s26 }
 0x311   :  { %769 = vrot.lane.b32.xlu1 %v2373_v36, %s2170_s26 }
 0x315   :  { %766 = vrot.lane.b32.xlu1 %v2384_v40, %s2170_s26 }
 0x381   :  { %v610_v20 = vpop.xlane.xlu1 %609 }
 0x382   :  { %1939 = vrcp.f32 %v610_v20 }
 0x389   :  { %v613_v21 = vpop.xlane.xlu1 %612 }
 0x38a   :  { %1941 = vrcp.f32 %v613_v21 }
 0x38c   :  { %v1940_v22 = vpop.eup %1939 }
 0x38d   :  { %v616_v23 = vmul.f32 %v1940_v22, %v1936_v5  ;;  %v715_v32 = vpop.permute.xlu1 %714 }
 0x38f   :  { %v618_v25 = vpack.c.bf16 %v616_v23, %v616_v23 }
 0x391   :  { %1769 = vmatmul.mubr.msk.bf16.vlgmr.msra.gmra.mrb[12].mxu1 %vm595_vm2, %v618_v25  ;;  %v770_v34 = vpop.permute.xlu1 %769 }
 0x392   :  { %1773 = vmatpush3.bf16.msra.mxu1 %v671_v26  ;;  %1774 = vmatprep.mubr.msk.bf16.mxu1 %vm2169_vm0, %v2168_v0  ;;  %v775_v35 = vsel %vm500_vm1, %v770_v34, 0 }
 0x393   :  { %1778 = vmatprep.subr.bf16.mxu1 %v2168_v0 }
 0x394   :  { %v1942_v27 = vpop.eup %1941 }
 0x395   :  { %v617_v29 = vmul.f32 %v1942_v27, %v1938_v7  ;;  %v767_v38 = vpop.permute.xlu1 %766 }
 0x397   :  { %v619_v31 = vpack.c.bf16 %v617_v29, %v617_v29 }
 0x399   :  { %1775 = vmatmul.mubr.msk.bf16.vlgmr.msra.gmra.mrb[16].mxu1 %vm595_vm2, %v619_v31 }
 0x39a   :  { %1780 = vmatprep.mubr.msk.bf16.mxu1 %vm2169_vm0, %v2168_v0 }
 0x39b   :  { %1779 = vmatpush3.bf16.xpose.msra.mxu1 %v723_v33 }
 0x39c   :  { %1784 = vmatprep.subr.bf16.mxu1 %v2168_v0 }
 0x3a2   :  { %1781 = vmatmul.mubr.msk.bf16.vlgmr.msra.gmra.mrb[20].mxu1 %vm500_vm1, %v715_v32 }
 0x3a3   :  { %1785 = vmatpush3.bf16.xpose.msra.mxu1 %v775_v35  ;;  %1786 = vmatprep.mubr.msk.bf16.mxu1 %vm2169_vm0, %v2168_v0 }
 0x3a4   :  { %1790 = vmatprep.subr.bf16.mxu1 %v2168_v0 }
 0x3aa   :  { %1787 = vmatmul.mubr.msk.bf16.vlgmr.msra.gmra.mrb[24].mxu1 %vm500_vm1, %v767_v38 }
 0x3ab   :  { %1792 = vmatprep.mubr.msk.bf16.mxu1 %vm2169_vm0, %v2168_v0 }
 0x464   :  { %v2441_v39 = vpop.f32.mrb[12].mxu1 }
 0x465   :  { %v1770_v41 = vpop.f32.mrb[13].mxu1 }
 0x466   :  { %v664_v42 = vpop.f32.mrb[14].mxu1 }
 0x467   :  { %v1771_v43 = vpop.f32.mrb[15].mxu1 }
 0x46c   :  { %v2443_v44 = vpop.f32.mrb[16].mxu1 }
 0x46d   :  { %v1776_v45 = vpop.f32.mrb[17].mxu1 }
 0x46e   :  { %v710_v46 = vpop.f32.mrb[18].mxu1 }
 0x46f   :  { %v1777_v47 = vpop.f32.mrb[19].mxu1 }
 0x475   :  { %v759_v48 = vpop.f32.mrb[20].mxu1 }
 0x476   :  { %v817_v49 = vmul.f32 0.17677669, %v759_v48  ;;  %v1782_v50 = vpop.f32.mrb[21].mxu1 }
 0x477   :  { %v762_v51 = vpop.f32.mrb[22].mxu1 }
 0x478   :  { %v1783_v52 = vpop.f32.mrb[23].mxu1  ;;  %v819_v53 = vsel %vm595_vm2, %v817_v49, -inf }
 0x479   :  { %820 = vmax.xlane.f32.xlu0 %v819_v53 }
 0x47d   :  { %v811_v54 = vpop.f32.mrb[24].mxu1 }
 0x47e   :  { %v818_v55 = vmul.f32 0.17677669, %v811_v54  ;;  %v1788_v56 = vpop.f32.mrb[25].mxu1 }
 0x47f   :  { %v814_v57 = vpop.f32.mrb[26].mxu1 }
 0x480   :  { %v1789_v58 = vpop.f32.mrb[27].mxu1  ;;  %v822_v59 = vsel %vm595_vm2, %v818_v55, -inf }
 0x481   :  { %823 = vmax.xlane.f32.xlu1 %v822_v59 }
 0x492   :  { %893 = vrot.lane.b32.xlu1 %v2420_v24, %s2170_s26 }
 0x496   :  { %943 = vrot.lane.b32.xlu1 %v2368_v28, %s2158_s15 }
 0x49a   :  { %993 = vrot.lane.b32.xlu1 %v2373_v36, %s2158_s15 }
 0x49e   :  { %991 = vrot.lane.b32.xlu1 %v2384_v40, %s2158_s15 }
 0x506   :  { %v821_v60 = vpop.xlane.xlu0 %820 }
 0x507   :  { %v825_v61 = vsub.f32 %v817_v49, %v821_v60 }
 0x509   :  { %v827_v62 = vmul.f32 1.442695, %v825_v61 }
 0x50b   :  { %1943 = vpow2.f32 %v827_v62 }
 0x50e   :  { %v824_v63 = vpop.xlane.xlu1 %823 }
 0x50f   :  { %v826_v1 = vsub.f32 %v818_v55, %v824_v63 }
 0x511   :  { %v829_v2 = vmul.f32 1.442695, %v826_v1 }
 0x512   :  { %v894_v3 = vpop.permute.xlu1 %893 }
 0x513   :  { %1945 = vpow2.f32 %v829_v2  ;;  %v899_v21 = vsel %vm623_vm3, %v894_v3, 0 }
 0x515   :  { %v1944_v4 = vpop.eup %1943 }
 0x516   :  { %v944_v5 = vpop.permute.xlu1 %943  ;;  %v831_v6 = vsel %vm595_vm2, %v1944_v4, 0.0 }
 0x517   :  { %v949_v7 = vsel %vm500_vm1, %v944_v5, 0  ;;  %832 = vadd.xlane.f32.xlu0 %v831_v6 }
 0x518   :  { %1803 = vmatpush3.bf16.xpose.msra.mxu0 %v949_v7 }
 0x519   :  { %1814 = vmatprep.subr.bf16.mxu0 %v2168_v0 }
 0x51a   :  { %v994_v26 = vpop.permute.xlu1 %993 }
 0x51b   :  { %v999_v27 = vsel %vm500_vm1, %v994_v26, 0 }
 0x51d   :  { %v1946_v8 = vpop.eup %1945 }
 0x51e   :  { %v834_v9 = vsel %vm595_vm2, %v1946_v8, 0.0  ;;  %v992_v29 = vpop.permute.xlu1 %991 }
 0x51f   :  { %835 = vadd.xlane.f32.xlu0 %v834_v9 }
 0x535   :  { %844 = vrot.lane.b32.xlu0 %v2409_v16, %s2170_s26 }
 0x539   :  { %941 = vrot.lane.b32.xlu0 %v2375_v37, %s2158_s15 }
 0x5a4   :  { %v833_v10 = vpop.xlane.xlu0 %832 }
 0x5a5   :  { %1947 = vrcp.f32 %v833_v10 }
 0x5ac   :  { %v836_v11 = vpop.xlane.xlu0 %835 }
 0x5ad   :  { %1949 = vrcp.f32 %v836_v11 }
 0x5af   :  { %v1948_v12 = vpop.eup %1947 }
 0x5b0   :  { %v839_v13 = vmul.f32 %v1948_v12, %v1944_v4  ;;  %v845_v14 = vpop.permute.xlu0 %844 }
 0x5b1   :  { %v850_v15 = vsel %vm623_vm3, %v845_v14, 0 }
 0x5b2   :  { %1791 = vmatpush3.bf16.msra.mxu1 %v850_v15  ;;  %v841_v19 = vpack.c.bf16 %v839_v13, %v839_v13 }
 0x5b3   :  { %1796 = vmatprep.subr.bf16.mxu1 %v2168_v0 }
 0x5b4   :  { %v942_v20 = vpop.permute.xlu0 %941 }
 0x5b5   :  { %1793 = vmatmul.mubr.msk.bf16.vlgmr.msra.gmra.mrb[28].mxu1 %vm595_vm2, %v841_v19  ;;  %1805 = vmatmul.mubr.msk.bf16.vlgmr.msra.gmra.mrb[8].mxu0 %vm500_vm1, %v942_v20 }
 0x5b6   :  { %1797 = vmatpush3.bf16.msra.mxu1 %v899_v21  ;;  %1798 = vmatprep.mubr.msk.bf16.mxu1 %vm2169_vm0, %v2168_v0 }
 0x5b7   :  { %v1950_v22 = vpop.eup %1949  ;;  %1808 = vmatprep.subr.bf16.mxu1 %v2168_v0  ;;  %1816 = vmatprep.mubr.msk.bf16.mxu0 %vm2169_vm0, %v2168_v0 }
 0x5b8   :  { %v840_v23 = vmul.f32 %v1950_v22, %v1946_v8 }
 0x5ba   :  { %v842_v25 = vpack.c.bf16 %v840_v23, %v840_v23 }
 0x5bd   :  { %1799 = vmatmul.mubr.msk.bf16.vlgmr.msra.gmra.mrb[32].mxu1 %vm595_vm2, %v842_v25 }
 0x5be   :  { %1810 = vmatprep.mubr.msk.bf16.mxu1 %vm2169_vm0, %v2168_v0 }
 0x5bf   :  { %1809 = vmatpush3.bf16.xpose.msra.mxu1 %v999_v27 }
 0x5c0   :  { %1820 = vmatprep.subr.bf16.mxu1 %v2168_v0 }
 0x5c6   :  { %1811 = vmatmul.mubr.msk.bf16.vlgmr.msra.gmra.mrb[36].mxu1 %vm500_vm1, %v992_v29 }
 0x5c7   :  { %1822 = vmatprep.mubr.msk.bf16.mxu1 %vm2169_vm0, %v2168_v0 }
 0x688   :  { %v2481_v30 = vpop.f32.mrb[28].mxu1  ;;  %v985_v31 = vpop.f32.mrb[8].mxu0 }
 0x689   :  { %v1041_v32 = vmul.f32 0.17677669, %v985_v31  ;;  %v1794_v33 = vpop.f32.mrb[29].mxu1  ;;  %v1806_v34 = vpop.f32.mrb[9].mxu0 }
 0x68a   :  { %v889_v35 = vpop.f32.mrb[30].mxu1  ;;  %v988_v38 = vpop.f32.mrb[10].mxu0 }
 0x68b   :  { %v1795_v41 = vpop.f32.mrb[31].mxu1  ;;  %v1807_v42 = vpop.f32.mrb[11].mxu0  ;;  %v1043_v43 = vsel %vm595_vm2, %v1041_v32, -inf }
 0x68c   :  { %1044 = vmax.xlane.f32.xlu0 %v1043_v43 }
 0x690   :  { %v2484_v45 = vpop.f32.mrb[32].mxu1 }
 0x691   :  { %v1886_v46 = vpack.i.bf16 %v2484_v45, %v2481_v30  ;;  %v1800_v47 = vpop.f32.mrb[33].mxu1 }
 0x692   :  { %v938_v48 = vpop.f32.mrb[34].mxu1 }
 0x693   :  { %v1801_v49 = vpop.f32.mrb[35].mxu1 }
 0x699   :  { %v1035_v50 = vpop.f32.mrb[36].mxu1 }
 0x69a   :  { %v1042_v51 = vmul.f32 0.17677669, %v1035_v50  ;;  %v1812_v52 = vpop.f32.mrb[37].mxu1 }
 0x69b   :  { %v1038_v53 = vpop.f32.mrb[38].mxu1 }
 0x69c   :  { %v1813_v54 = vpop.f32.mrb[39].mxu1  ;;  %v1046_v55 = vsel %vm595_vm2, %v1042_v51, -inf }
 0x69d   :  { %1047 = vmax.xlane.f32.xlu1 %v1046_v55 }
 0x6ae   :  { %1115 = vrot.lane.b32.xlu1 %v2420_v24, %s2158_s15 }
 0x6b2   :  { %1165 = vrot.lane.b32.xlu1 %v2368_v28, %s2171_s30 }
 0x6b6   :  { %1215 = vrot.lane.b32.xlu1 %v2373_v36, %s2171_s30 }
 0x6ba   :  { %1213 = vrot.lane.b32.xlu1 %v2384_v40, %s2171_s30 }
 0x719   :  { %v1045_v56 = vpop.xlane.xlu0 %1044 }
 0x71a   :  { %v1049_v57 = vsub.f32 %v1041_v32, %v1045_v56 }
 0x71c   :  { %v1051_v58 = vmul.f32 1.442695, %v1049_v57 }
 0x71e   :  { %1951 = vpow2.f32 %v1051_v58 }
 0x728   :  { %v1952_v59 = vpop.eup %1951 }
 0x729   :  { %v1055_v60 = vsel %vm595_vm2, %v1952_v59, 0.0 }
 0x72a   :  { %1056 = vadd.xlane.f32.xlu0 %v1055_v60  ;;  %v1048_v61 = vpop.xlane.xlu1 %1047 }
 0x72b   :  { %v1050_v62 = vsub.f32 %v1042_v51, %v1048_v61 }
 0x72d   :  { %v1053_v63 = vmul.f32 1.442695, %v1050_v62 }
 0x72e   :  { %v1116_v1 = vpop.permute.xlu1 %1115 }
 0x72f   :  { %1953 = vpow2.f32 %v1053_v63  ;;  %v1121_v28 = vsel %vm623_vm3, %v1116_v1, 0 }
 0x730   :  { %1821 = vmatpush3.bf16.msra.mxu1 %v1121_v28 }
 0x731   :  { %1832 = vmatprep.subr.bf16.mxu1 %v2168_v0 }
 0x732   :  { %v1166_v8 = vpop.permute.xlu1 %1165 }
 0x733   :  { %v1171_v12 = vsel %vm500_vm1, %v1166_v8, 0  ;;  %v1933_v8 = vld [vmem:[#allocation13 + $0x30] sm:$0xff]  }
 0x736   :  { %v1216_v11 = vpop.permute.xlu1 %1215 }
 0x737   :  { %v1221_v14 = vsel %vm500_vm1, %v1216_v11, 0 }
 0x739   :  { %v1954_v36 = vpop.eup %1953 }
 0x73a   :  { %v1058_v40 = vsel %vm595_vm2, %v1954_v36, 0.0  ;;  %v1214_v19 = vpop.permute.xlu1 %1213 }
 0x73b   :  { %1059 = vadd.xlane.f32.xlu0 %v1058_v40 }
 0x751   :  { %1067 = vrot.lane.b32.xlu0 %v2409_v16, %s2158_s15 }
 0x755   :  { %1163 = vrot.lane.b32.xlu0 %v2375_v37, %s2171_s30 }
 0x7b7   :  { %v1057_v2 = vpop.xlane.xlu0 %1056 }
 0x7b8   :  { %1955 = vrcp.f32 %v1057_v2  ;;  %v1927_v2 = vld [vmem:[#allocation13] sm:$0xff]  }
 0x7c2   :  { %v1956_v3 = vpop.eup %1955 }
 0x7c3   :  { %v1063_v5 = vmul.f32 %v1956_v3, %v1952_v59  ;;  %v1928_v3 = vld [vmem:[#allocation13 + $0x8] sm:$0xff]  }
 0x7c5   :  { %v1065_v9 = vpack.c.bf16 %v1063_v5, %v1063_v5  ;;  %v1930_v5 = vld [vmem:[#allocation13 + $0x18] sm:$0xff]  }
 0x7c8   :  { %v1060_v4 = vpop.xlane.xlu0 %1059 }
 0x7c9   :  { %1957 = vrcp.f32 %v1060_v4  ;;  %v1929_v4 = vld [vmem:[#allocation13 + $0x10] sm:$0xff]  }
 0x7cc   :  { %v1068_v6 = vpop.permute.xlu0 %1067 }
 0x7cd   :  { %v1073_v7 = vsel %vm623_vm3, %v1068_v6, 0  ;;  %v1931_v6 = vld [vmem:[#allocation13 + $0x20] sm:$0xff]  }
 0x7ce   :  { %1815 = vmatpush3.bf16.msra.mxu0 %v1073_v7  ;;  %v1932_v7 = vld [vmem:[#allocation13 + $0x28] sm:$0xff]  }
 0x7cf   :  { %1826 = vmatprep.subr.bf16.mxu0 %v2168_v0 }
 0x7d0   :  { %v1164_v15 = vpop.permute.xlu0 %1163 }
 0x7d1   :  { %1817 = vmatmul.mubr.msk.bf16.vlgmr.msra.gmra.mrb[12].mxu0 %vm595_vm2, %v1065_v9  ;;  %v1934_v9 = vld [vmem:[#allocation13 + $0x38] sm:$0xff]  }
 0x7d2   :  { %1828 = vmatprep.mubr.msk.bf16.mxu0 %vm2169_vm0, %v2168_v0 }
 0x7d3   :  { %v1958_v37 = vpop.eup %1957 }
 0x7d4   :  { %v1064_v10 = vmul.f32 %v1958_v37, %v1954_v36 }
 0x7d6   :  { %v1066_v13 = vpack.c.bf16 %v1064_v10, %v1064_v10 }
 0x7d7   :  { %1827 = vmatpush3.bf16.xpose.msra.mxu0 %v1171_v12 }
 0x7d8   :  { %1823 = vmatmul.mubr.msk.bf16.vlgmr.msra.gmra.mrb[40].mxu1 %vm595_vm2, %v1066_v13  ;;  %1838 = vmatprep.subr.bf16.mxu0 %v2168_v0 }
 0x7d9   :  { %1833 = vmatpush3.bf16.xpose.msra.mxu1 %v1221_v14  ;;  %1834 = vmatprep.mubr.msk.bf16.mxu1 %vm2169_vm0, %v2168_v0 }
 0x7da   :  { %1844 = vmatprep.subr.bf16.mxu1 %v2168_v0 }
 0x7de   :  { %1829 = vmatmul.mubr.msk.bf16.vlgmr.msra.gmra.mrb[16].mxu0 %vm500_vm1, %v1164_v15 }
 0x7df   :  { %1840 = vmatprep.mubr.msk.bf16.mxu0 %vm2169_vm0, %v2168_v0 }
 0x7e0   :  { %1835 = vmatmul.mubr.msk.bf16.vlgmr.msra.gmra.mrb[44].mxu1 %vm500_vm1, %v1214_v19 }
 0x7e1   :  { %1846 = vmatprep.mubr.msk.bf16.mxu1 %vm2169_vm0, %v2168_v0 }
 0x8a4   :  { %v1109_v20 = vpop.f32.mrb[12].mxu0 }
 0x8a5   :  { %v1818_v21 = vpop.f32.mrb[13].mxu0 }
 0x8a6   :  { %v1112_v22 = vpop.f32.mrb[14].mxu0 }
 0x8a7   :  { %v1819_v23 = vpop.f32.mrb[15].mxu0 }
 0x8ab   :  { %v1157_v25 = vpop.f32.mrb[40].mxu1 }
 0x8ac   :  { %v1891_v26 = vpack.i.bf16 %v1157_v25, %v1109_v20  ;;  %v1824_v27 = vpop.f32.mrb[41].mxu1 }
 0x8ad   :  { %v1160_v29 = vpop.f32.mrb[42].mxu1 }
 0x8ae   :  { %v1825_v31 = vpop.f32.mrb[43].mxu1 }
 0x8b1   :  { %v1207_v32 = vpop.f32.mrb[16].mxu0 }
 0x8b2   :  { %v1263_v33 = vmul.f32 0.17677669, %v1207_v32  ;;  %v1830_v34 = vpop.f32.mrb[17].mxu0 }
 0x8b3   :  { %v1210_v35 = vpop.f32.mrb[18].mxu0  ;;  %v1257_v38 = vpop.f32.mrb[44].mxu1 }
 0x8b4   :  { %v1264_v41 = vmul.f32 0.17677669, %v1257_v38  ;;  %v1831_v42 = vpop.f32.mrb[19].mxu0  ;;  %v1836_v43 = vpop.f32.mrb[45].mxu1  ;;  %v1265_v47 = vsel %vm595_vm2, %v1263_v33, -inf }
 0x8b5   :  { %1266 = vmax.xlane.f32.xlu0 %v1265_v47  ;;  %v1260_v48 = vpop.f32.mrb[46].mxu1  ;;  %v1615_v43 = vld [vmem:[%s2588_s7 + $0x3] ss:$0 sm:$0xff] }
 0x8b6   :  { %v1837_v49 = vpop.f32.mrb[47].mxu1  ;;  %v1268_v50 = vsel %vm595_vm2, %v1264_v41, -inf }
 0x8b7   :  { %1269 = vmax.xlane.f32.xlu1 %v1268_v50 }
 0x8c8   :  { %1337 = vrot.lane.b32.xlu1 %v2420_v24, %s2171_s30 }
 0x8cc   :  { %1887 = vrot.lane.b32.xlu1 %v1886_v46, %s2171_s30 }
 0x8d0   :  { %1892 = vrot.lane.b32.xlu1 %v1891_v26, %s2158_s15 }
 0x942   :  { %v1267_v51 = vpop.xlane.xlu0 %1266 }
 0x943   :  { %v1271_v52 = vsub.f32 %v1263_v33, %v1267_v51 }
 0x944   :  { %v1270_v53 = vpop.xlane.xlu1 %1269 }
 0x945   :  { %v1273_v54 = vmul.f32 1.442695, %v1271_v52  ;;  %v1272_v55 = vsub.f32 %v1264_v41, %v1270_v53 }
 0x947   :  { %1959 = vpow2.f32 %v1273_v54  ;;  %v1275_v56 = vmul.f32 1.442695, %v1272_v55 }
 0x948   :  { %v1338_v57 = vpop.permute.xlu1 %1337 }
 0x949   :  { %1961 = vpow2.f32 %v1275_v56  ;;  %v1343_v58 = vsel %vm623_vm3, %v1338_v57, 0 }
 0x94a   :  { %1845 = vmatpush3.bf16.msra.mxu1 %v1343_v58 }
 0x94c   :  { %v1888_v21 = vpop.permute.xlu1 %1887 }
 0x94d   :  { %v1890_v23 = vunpack.i.h.bf16 %v1888_v21  ;;  %v1889_v25 = vunpack.i.l.bf16 %v1888_v21 }
 0x94f   :  { %v1410_v29 = vsel %vm500_vm1, %v2443_v44, %v1890_v23  ;;  %v1409_v31 = vsel %vm500_vm1, %v2441_v39, %v1889_v25 }
 0x950   :  { %v1893_v22 = vpop.permute.xlu1 %1892 }
 0x951   :  { %v1960_v24 = vpop.eup %1959  ;;  %v1895_v26 = vunpack.i.h.bf16 %v1893_v22  ;;  %v1894_v27 = vunpack.i.l.bf16 %v1893_v22 }
 0x952   :  { %v1277_v59 = vsel %vm595_vm2, %v1960_v24, 0.0 }
 0x953   :  { %v1962_v60 = vpop.eup %1961  ;;  %1278 = vadd.xlane.f32.xlu0 %v1277_v59  ;;  %v1412_v34 = vsel %vm1411_vm4, %v1409_v31, %v1894_v27  ;;  %v1413_v35 = vsel %vm1411_vm4, %v1410_v29, %v1895_v26 }
 0x954   :  { %v1280_v30 = vsel %vm595_vm2, %v1962_v60, 0.0 }
 0x957   :  { %1281 = vadd.xlane.f32.xlu0 %v1280_v30 }
 0x96d   :  { %1289 = vrot.lane.b32.xlu0 %v2409_v16, %s2171_s30 }
 0x9e0   :  { %v1279_v45 = vpop.xlane.xlu0 %1278 }
 0x9e1   :  { %1963 = vrcp.f32 %v1279_v45 }
 0x9e4   :  { %v1282_v46 = vpop.xlane.xlu0 %1281 }
 0x9e5   :  { %1965 = vrcp.f32 %v1282_v46 }
 0x9e8   :  { %v1290_v61 = vpop.permute.xlu0 %1289 }
 0x9e9   :  { %v1295_v62 = vsel %vm623_vm3, %v1290_v61, 0 }
 0x9ea   :  { %1839 = vmatpush3.bf16.msra.mxu0 %v1295_v62  ;;  %v1624_v62 = vld [vmem:[%s2588_s7 + $0x4] ss:$0 sm:$0xff] }
 0x9eb   :  { %v1964_v63 = vpop.eup %1963  ;;  %1850 = vmatprep.subr.bf16.mxu0 %v2168_v0 }
 0x9ec   :  { %v1285_v1 = vmul.f32 %v1964_v63, %v1960_v24 }
 0x9ee   :  { %v1287_v28 = vpack.c.bf16 %v1285_v1, %v1285_v1  ;;  %v1625_v1 = vld [vmem:[%s2588_s7 + $0x5] ss:$0 sm:$0xff] }
 0x9ef   :  { %v1966_v36 = vpop.eup %1965 }
 0x9f0   :  { %v1286_v40 = vmul.f32 %v1966_v36, %v1962_v60  ;;  %1841 = vmatmul.mubr.msk.bf16.vlgmr.msra.gmra.mrb[20].mxu0 %vm595_vm2, %v1287_v28 }
 0x9f1   :  { %1866 = vmatprep.mubr.msk.bf16.mxu0 %vm2169_vm0, %v2168_v0  ;;  %1851 = vmatpush3.bf16.msra.mxu0 %v1927_v2 }
 0x9f2   :  { %v1288_v16 = vpack.c.bf16 %v1286_v40, %v1286_v40  ;;  %1852 = vmatprep.subr.bf16.mxu0 %v2168_v0 }
 0x9f4   :  { %1847 = vmatmul.mubr.msk.bf16.vlgmr.msra.gmra.mrb[48].mxu1 %vm595_vm2, %v1288_v16 }
 0x9f5   :  { %1853 = vmatpush3.bf16.msra.mxu0 %v1928_v3 }
 0x9f6   :  { %1854 = vmatprep.subr.bf16.mxu0 %v2168_v0 }
 0x9f9   :  { %1855 = vmatpush3.bf16.msra.mxu0 %v1929_v4 }
 0x9fa   :  { %1856 = vmatprep.subr.bf16.mxu0 %v2168_v0 }
 0x9fd   :  { %1857 = vmatpush3.bf16.msra.mxu0 %v1930_v5 }
 0x9fe   :  { %1858 = vmatprep.subr.bf16.mxu0 %v2168_v0 }
 0xa01   :  { %1859 = vmatpush3.bf16.msra.mxu0 %v1931_v6 }
 0xa02   :  { %1860 = vmatprep.subr.bf16.mxu0 %v2168_v0 }
 0xa05   :  { %1861 = vmatpush3.bf16.msra.mxu0 %v1932_v7 }
 0xa06   :  { %1862 = vmatprep.subr.bf16.mxu0 %v2168_v0 }
 0xa09   :  { %1863 = vmatpush3.bf16.msra.mxu0 %v1933_v8 }
 0xa0a   :  { %1864 = vmatprep.subr.bf16.mxu0 %v2168_v0 }
 0xa0d   :  { %1865 = vmatpush3.bf16.msra.mxu0 %v1934_v9 }
 0xac3   :  { %v1331_v37 = vpop.f32.mrb[20].mxu0 }
 0xac4   :  { %v1842_v10 = vpop.f32.mrb[21].mxu0 }
 0xac5   :  { %v1334_v11 = vpop.f32.mrb[22].mxu0 }
 0xac6   :  { %v1843_v12 = vpop.f32.mrb[23].mxu0 }
 0xac7   :  { %v1379_v13 = vpop.f32.mrb[48].mxu1 }
 0xac8   :  { %v1896_v14 = vpack.i.bf16 %v1379_v13, %v1331_v37  ;;  %v1848_v15 = vpop.f32.mrb[49].mxu1 }
 0xac9   :  { %v1382_v19 = vpop.f32.mrb[50].mxu1 }
 0xaca   :  { %1897 = vrot.lane.b32.xlu0 %v1896_v14, %s2170_s26  ;;  %v1849_v20 = vpop.f32.mrb[51].mxu1 }
 0xb3c   :  { %v1898_v0 = vpop.permute.xlu0 %1897 }
 0xb3d   :  { %v1900_v32 = vunpack.i.h.bf16 %v1898_v0  ;;  %v1899_v33 = vunpack.i.l.bf16 %v1898_v0 }
 0xb3f   :  { %v1416_v38 = vsel %vm1414_vm5, %v1413_v35, %v1900_v32  ;;  %v1415_v41 = vsel %vm1414_vm5, %v1412_v34, %v1899_v33 }
 0xb40   :  { %v1417_v42 = vpack.c.bf16 %v1416_v38, %v1415_v41 }
 0xb42   :  { %1867 = vmatmul.mubr.bf16.vlgmr.msra.gmra.mrb[24].mxu0 %v1417_v42 }
 0xc15   :  { %v1504_v47 = vpop.f32.mrb[24].mxu0 }
 0xc16   :  { %v1505_v48 = vadd.f32 %v1615_v43, %v1504_v47  ;;  %v1868_v49 = vpop.f32.mrb[25].mxu0 }
 0xc17   :  { %v1507_v50 = vpop.f32.mrb[26].mxu0 }
 0xc18   :  { %v1508_v44 = vadd.f32 %v1615_v43, %v1507_v50  ;;  %v1869_v51 = vpop.f32.mrb[27].mxu0  ;;  %v1511_v39 = vadd.f32 %v1505_v48, %v2348_v17 }
 0xc1a   :  { %1513 = vadd.xlane.f32.xlu1 %v1511_v39  ;;  %v1512_v52 = vadd.f32 %v1508_v44, %v2350_v18 }
 0xc1c   :  { %1515 = vadd.xlane.f32.xlu0 %v1512_v52 }
 0xca7   :  { %v1514_v53 = vpop.xlane.xlu1 %1513 }
 0xca8   :  { %v1518_v54 = vmul.f32 0.0078125, %v1514_v53 }
 0xca9   :  { %v1516_v55 = vpop.xlane.xlu0 %1515 }
 0xcaa   :  { %v1520_v56 = vsub.f32 %v1511_v39, %v1518_v54  ;;  %v1519_v57 = vmul.f32 0.0078125, %v1516_v55 }
 0xcac   :  { %v1521_v58 = vsub.f32 %v1512_v52, %v1519_v57  ;;  %v1522_v24 = vmul.f32 %v1520_v56, %v1520_v56 }
 0xcae   :  { %1524 = vadd.xlane.f32.xlu0 %v1522_v24  ;;  %v1523_v59 = vmul.f32 %v1521_v58, %v1521_v58 }
 0xcb2   :  { %1526 = vadd.xlane.f32.xlu0 %v1523_v59 }
 0xd3b   :  { %v1525_v60 = vpop.xlane.xlu0 %1524 }
 0xd3c   :  { %v1528_v30 = vmul.f32 0.0078125, %v1525_v60 }
 0xd3e   :  { %v1530_v45 = vadd.f32 1e-05, %v1528_v30 }
 0xd3f   :  { %v1527_v46 = vpop.xlane.xlu0 %1526 }
 0xd40   :  { %1967 = vrsqrt.f32 %v1530_v45  ;;  %v1529_v17 = vmul.f32 0.0078125, %v1527_v46 }
 0xd42   :  { %v1531_v61 = vadd.f32 1e-05, %v1529_v17 }
 0xd44   :  { %1969 = vrsqrt.f32 %v1531_v61 }
 0xd4a   :  { %v1968_v18 = vpop.eup %1967 }
 0xd4b   :  { %v1534_v63 = vmul.f32 %v1968_v18, %v1520_v56 }
 0xd4d   :  { %v1540_v28 = vmul.f32 %v1624_v62, %v1534_v63 }
 0xd4e   :  { %v1970_v36 = vpop.eup %1969 }
 0xd4f   :  { %v1535_v40 = vmul.f32 %v1970_v36, %v1521_v58  ;;  %v1546_v16 = vadd.f32 %v1625_v1, %v1540_v28 }
 0xd51   :  { %v1541_v2 = vmul.f32 %v1624_v62, %v1535_v40  ;;  %1548 = vst [vmem:[#allocation14] sm:$0xff] %v1546_v16 }
 0xd53   :  { %v1547_v3 = vadd.f32 %v1625_v1, %v1541_v2 }
 0xd55   :  { %1549 = vst [vmem:[#allocation14 + $0x8] sm:$0xff] %v1547_v3 }
 0xd56   :  { %2136 = shalt.err (!%p2133_p4)
}
 0xd57   :  { %s2137_s18 = scalar_lea.hbm %s2589_s8, 256 }
 0xd58   :  { %p2138_p5 = scmp.ne.s32.totalorder %s2589_s8, %s2137_s18  ;;  %p2141_p6 = scmp.lt.u32.totalorder %s2137_s18, %s2589_s8 }
 0xd5a   :  { %p2143_p7 = pnand %p2141_p6, %p2138_p5 }
 0xd5c   :  { %2146 = shalt.err (!%p2143_p7)
}
 0xd5d   :  { %1561 = dma.vmem_to_hbm [thread:$0]  %s1556_s12, 256, %s2589_s8, [#allocation4], %s2163_s5, %s2163_s5, %s2164_s22  }
 0xd5e   :  { %2155 = dma.done.wait [#allocation4], 256  }
 0xd5f   :  { %2156 = vsyncadd [#allocation4], 4294967040 }
 0xd60   :  { %1565 = vsyncpa [#allocation3], 1 }
 0xd61   :  { %1566 = vsyncpa [#allocation6], 1 }
 0xd62   :  { %1567 = vsyncpa [#allocation9], 1 }
 0xd63   :  { %1568 = vsyncpa [#allocation12], 1 }
 0xd64   :  { %1569 = vsyncpa [#allocation4], 1 }

</bundles_post_ra>
